<compile_context>
chip_gen: v5e
topology: v5e:2x2
jax: 0.10.0
libtpu: 0.0.40
codegen_flags: <defaults>
</compile_context>

<pallas_src>
import functools

import jax
import jax.numpy as jnp
from jax.experimental import pallas as pl
from jax.experimental.pallas import tpu as pltpu


def _round_up(x, m):
    return ((x + m - 1) // m) * m


def _choose_nb(n, max_nb=8):
    """Largest divisor of n that is <= max_nb while keeping grid length >= 2
    when possible (so ("parallel",) can shard steps across v7x's two TCs)."""
    best = 1
    for nb in range(1, min(n, max_nb) + 1):
        if n % nb == 0 and (n // nb >= 2 or n == 1):
            best = nb
    return best


# ----------------------------------------------------------------------------
# Fused Pallas kernel: L x (conv3x3 + folded-BN shift + ReLU) for Nb images.
#
# Layout: every activation is a (CP, Nb*HW) slab with spatial (H*W) on the
# lane axis.  Conv taps are read from a flat-padded staging buffer where each
# image owns a SEG-lane segment [LEAD halo | HW interior | tail halo]; a tap
# with spatial offset (kh-1, kw-1) is a static lane slice at offset
# (kh-1)*W + (kw-1).  Row over/underflow lands in the zeroed halos; column
# wrap-around is killed by two precomputed column masks (kw == 0 and kw == 2).
# ----------------------------------------------------------------------------
def _res_block_kernel(x_ref, mask_ref, w_ref, b_ref, out_ref, buf_ref,
                      patch_ref, *, num_layers, CP, W, HW, Nb, SEG, LEAD):
    # x_ref     : (Nb, CP, HW)    f32   Nb images, channels zero-padded to CP
    # mask_ref  : (2, HW)         f32   row0 kills col==0, row1 kills col==W-1
    # w_ref     : (L, CP, 9*CP)   bf16  folded conv+BN weight matrices
    # b_ref     : (L, CP, 1)      f32   folded BN shifts (zero-padded rows)
    # out_ref   : (L, Nb, CP, HW) f32   per-layer activations
    # buf_ref   : (CP, Nb*SEG)    f32   flat-padded staging (128-aligned interiors)
    # patch_ref : (9*CP, Nb*HW)   bf16  im2col matrix (one MXU matmul per layer)
    TAIL = SEG - LEAD - HW
    zeros_lead = jnp.zeros((CP, LEAD), jnp.float32)
    zeros_tail = jnp.zeros((CP, TAIL), jnp.float32)

    # Zero only the halo columns; interiors (all CP rows) are fully rewritten
    # with zero-padded data each step, and nothing ever writes the halos.
    for n in range(Nb):
        s = n * SEG
        buf_ref[:, s:s + LEAD] = zeros_lead
        buf_ref[:, s + LEAD + HW:s + SEG] = zeros_tail
        buf_ref[:, s + LEAD:s + LEAD + HW] = x_ref[n]

    mask_l = mask_ref[0:1, :]      # (1, HW) for kw == 0 taps
    mask_r = mask_ref[1:2, :]      # (1, HW) for kw == 2 taps

    # TODO(synk): switch to lax.fori_loop over pl.ds-indexed weight slices if
    # num_layers grows (bounds vreg live ranges for deep blocks).
    for l in range(num_layers):
        # ---- im2col: 9 statically shifted lane slices per image.
        # Mask-mul in f32 (v5e has no bf16 VALU); cast to bf16 at the store.
        for kh in range(3):
            for kw in range(3):
                t = kh * 3 + kw
                off = (kh - 1) * W + (kw - 1)
                for n in range(Nb):
                    base = n * SEG + LEAD
                    tap = buf_ref[:, base + off: base + off + HW]   # (CP, HW)
                    if kw == 0:
                        tap = tap * mask_l
                    elif kw == 2:
                        tap = tap * mask_r
                    patch_ref[t * CP:(t + 1) * CP, n * HW:(n + 1) * HW] = (
                        tap.astype(patch_ref.dtype))
        # ---- one bf16 MXU matmul per layer, f32 accumulation.
        y = jnp.dot(w_ref[l], patch_ref[...],
                    preferred_element_type=jnp.float32)   # (CP, Nb*HW)
        # ---- folded BN shift + ReLU (scale already folded into weights).
        y = jnp.maximum(y + b_ref[l], 0.0)
        for n in range(Nb):
            out_ref[l, n, :, :] = y[:, n * HW:(n + 1) * HW].astype(out_ref.dtype)
            # keep the intermediate resident in VMEM for the next layer
            # (padded rows of y are exactly 0, so the zero-row invariant holds).
            if l + 1 < num_layers:
                buf_ref[:, n * SEG + LEAD:n * SEG + LEAD + HW] = (
                    y[:, n * HW:(n + 1) * HW])


@functools.partial(jax.jit, static_argnames=("H", "W"))
def _res_block_pallas(x_pad, col_mask, w_all, b_all, *, H, W):
    """x_pad: (N, CP, H*W) f32.  Returns (L, N, CP, H*W) f32 activations."""
    N, CP, HW = x_pad.shape
    L = w_all.shape[0]
    Nb = _choose_nb(N)
    LEAD = _round_up(max(128, W + 1), 128)          # 128-aligned interiors
    SEG = _round_up(LEAD + HW + (W + 1), 128)       # per-image segment length

    kernel = functools.partial(_res_block_kernel, num_layers=L, CP=CP, W=W,
                               HW=HW, Nb=Nb, SEG=SEG, LEAD=LEAD)

    grid_spec = pltpu.PrefetchScalarGridSpec(
        num_scalar_prefetch=0,
        grid=(N // Nb,),
        in_specs=[
            pl.BlockSpec((Nb, CP, HW), lambda b: (b, 0, 0)),       # images
            pl.BlockSpec((2, HW), lambda b: (0, 0)),               # column masks
            pl.BlockSpec((L, CP, 9 * CP), lambda b: (0, 0, 0)),    # stacked weights
            pl.BlockSpec((L, CP, 1), lambda b: (0, 0, 0)),         # stacked shifts
        ],
        out_specs=pl.BlockSpec((L, Nb, CP, HW), lambda b: (0, b, 0, 0)),
        scratch_shapes=[
            pltpu.VMEM((CP, Nb * SEG), jnp.float32),               # flat staging
            pltpu.VMEM((9 * CP, Nb * HW), jnp.bfloat16),           # im2col patches
        ])

    flops = 2 * L * CP * (9 * CP) * (N * HW)
    bytes_accessed = (x_pad.size * 4 + L * N * CP * HW * 4
                      + w_all.size * 2 + b_all.size * 4 + col_mask.size * 4)

    return pl.pallas_call(
        kernel,
        out_shape=jax.ShapeDtypeStruct((L, N, CP, HW), jnp.float32),
        grid_spec=grid_spec,
        compiler_params=pltpu.CompilerParams(
            dimension_semantics=("parallel",),
            vmem_limit_bytes=32 * 1024 * 1024),
        cost_estimate=pl.CostEstimate(flops=flops, transcendentals=0,
                                      bytes_accessed=bytes_accessed),
    )(x_pad, col_mask, w_all, b_all)


# ----------------------------------------------------------------------------
# Wrapper: parameter folding + layout plumbing (all tiny XLA ops).
# ----------------------------------------------------------------------------
def _fold_layer(params, C, CP):
    """Fold BN scale into the conv weights; lay out a (CP, 9*CP) bf16 matrix."""
    w = params["w"] * params["scale"][None, None, None, :]       # (3,3,C,C) HWIO
    w = jnp.pad(w, ((0, 0), (0, 0), (0, CP - C), (0, CP - C)))   # pad Cin,Cout -> CP
    # column index = (kh*3 + kw)*CP + ci  — must match the kernel's patch rows.
    w_mat = jnp.transpose(w, (3, 0, 1, 2)).reshape(CP, 9 * CP)
    shift = jnp.pad(params["shift"], ((0, CP - C),)).reshape(CP, 1)
    return w_mat.astype(jnp.bfloat16), shift.astype(jnp.float32)


def res_block_forward(layers, x_nchw):
    """Mirrors ResBlock.forward: returns (out, {name: activation}) in NCHW."""
    N, C, H, W = x_nchw.shape
    for p in layers:
        assert p["w"].shape == (3, 3, C, C), (
            "fused kernel assumes channel-preserving 3x3 conv sub-layers")
    CP = _round_up(C, 16)     # bf16 sublane quantum: keeps all stores tile-aligned

    folded = [_fold_layer(p, C, CP) for p in layers]
    w_all = jnp.stack([f[0] for f in folded])     # (L, CP, 9*CP) bf16
    b_all = jnp.stack([f[1] for f in folded])     # (L, CP, 1)    f32

    # Column-border masks for the flattened-spatial conv taps.
    col = jnp.arange(H * W, dtype=jnp.int32) % W
    col_mask = jnp.stack([(col > 0), (col < W - 1)]).astype(jnp.float32)  # (2, HW)

    # NCHW stays put: spatial flattens onto the lane axis, channels pad to CP.
    x_pad = jnp.pad(x_nchw.reshape(N, C, H * W), ((0, 0), (0, CP - C), (0, 0)))

    acts_all = _res_block_pallas(x_pad, col_mask, w_all, b_all, H=H, W=W)
    acts_all = acts_all[:, :, :C, :].reshape(len(layers), N, C, H, W)

    acts = {p["name"]: acts_all[i] for i, p in enumerate(layers)}
    out = acts[layers[-1]["name"]]
    return out, acts


# ----------------------------------------------------------------------------
# Parameter init (deterministic) and a pure-JAX reference for verification.
# ----------------------------------------------------------------------------
def make_layer_params(key, cin, cout, name):
    kw_key, g_key, b_key, m_key, v_key = jax.random.split(key, 5)
    fan_in = 3 * 3 * cin
    w = jax.random.normal(kw_key, (3, 3, cin, cout), jnp.float32) * (
        2.0 / fan_in) ** 0.5
    gamma = 1.0 + 0.1 * jax.random.normal(g_key, (cout,), jnp.float32)
    beta = 0.1 * jax.random.normal(b_key, (cout,), jnp.float32)
    running_mean = 0.1 * jax.random.normal(m_key, (cout,), jnp.float32)
    running_var = jnp.abs(1.0 + 0.1 * jax.random.normal(v_key, (cout,),
                                                        jnp.float32))
    eps = 1e-5
    scale = gamma / jnp.sqrt(running_var + eps)   # fold BN(eval) into affine
    shift = beta - running_mean * scale
    return {"name": name, "w": w, "scale": scale, "shift": shift}


def res_block_reference(layers, x_nchw):
    out = x_nchw
    acts = {}
    for p in layers:
        y = jax.lax.conv_general_dilated(
            out, p["w"], window_strides=(1, 1), padding="SAME",
            dimension_numbers=("NCHW", "HWIO", "NCHW"),
            precision=jax.lax.Precision.HIGHEST)
        y = (y * p["scale"][None, :, None, None]
             + p["shift"][None, :, None, None])
        out = jnp.maximum(y, 0.0)
        acts[p["name"]] = out
    return out, acts


# ----------------------------------------------------------------------------
if __name__ == "__main__":
    key = jax.random.PRNGKey(0)
    k_x, k_l0, k_l1 = jax.random.split(key, 3)

    # Small CIFAR-like shapes (NCHW): batch=4 so the kernel demonstrates
    # Nb=2 image batching per grid step while keeping grid length 2.
    N, C, H, W = 4, 4, 16, 16
    x = jax.random.normal(k_x, (N, C, H, W), jnp.float32)

    # Two conv-bn-relu sub-layers (channel-preserving), like a basic block.
    layers = [
        make_layer_params(k_l0, C, C, "layer0"),
        make_layer_params(k_l1, C, C, "layer1"),
    ]

    out, acts = res_block_forward(layers, x)
    out = jax.block_until_ready(out)
    for v in acts.values():
        jax.block_until_ready(v)

    # Correctness check against a plain-JAX reference (Precision.HIGHEST).
    # The kernel uses bf16 MXU operands with f32 accumulation, so the expected
    # deviation is O(1e-2) from operand rounding; tolerance documents that.
    ref_out, ref_acts = res_block_reference(layers, x)
    for name, ref_v in ref_acts.items():
        err = float(jnp.max(jnp.abs(acts[name] - ref_v)))
        assert err < 5e-2, f"{name} mismatch: max abs err {err}"
    assert float(jnp.max(jnp.abs(out - ref_out))) < 5e-2
    assert out.shape == (N, C, H, W)
    assert set(acts.keys()) == {"layer0", "layer1"}
    print("KERNEL_OK")
</pallas_src>

<mosaic_0001>
module attributes {stable_mosaic.version = 11 : i64} {
  func.func @_res_block_kernel(%arg0: i32, %arg1: memref<2x16x256xf32, #tpu.memory_space<vmem>>, %arg2: memref<2x256xf32, #tpu.memory_space<vmem>>, %arg3: memref<2x16x144xbf16, #tpu.memory_space<vmem>>, %arg4: memref<2x16x1xf32, #tpu.memory_space<vmem>>, %arg5: memref<2x2x16x256xf32, #tpu.memory_space<vmem>>, %arg6: memref<16x1024xf32, #tpu.memory_space<vmem>>, %arg7: memref<144x512xbf16, #tpu.memory_space<vmem>>) attributes {dimension_semantics = [#tpu.dimension_semantics<parallel>], iteration_bounds = array<i64: 2>, scalar_prefetch = 0 : i64, scratch_operands = 2 : i64, tpu.core_type = #tpu.core_type<tc>, window_params = [{transform_indices = @transform_0, window_bounds = array<i64: 2, 16, 256>}, {pipeline_mode = #tpu.pipeline_mode<synchronous>, transform_indices = @transform_1, window_bounds = array<i64: 2, 256>}, {pipeline_mode = #tpu.pipeline_mode<synchronous>, transform_indices = @transform_2, window_bounds = array<i64: 2, 16, 144>}, {pipeline_mode = #tpu.pipeline_mode<synchronous>, transform_indices = @transform_3, window_bounds = array<i64: 2, 16, 1>}, {transform_indices = @transform_4, window_bounds = array<i64: 2, 2, 16, 256>}]} {
    %cst = arith.constant 0.000000e+00 : f32
    %0 = vector.broadcast %cst : f32 to vector<16x128xf32>
    %cst_0 = arith.constant 0.000000e+00 : f32
    %1 = vector.broadcast %cst_0 : f32 to vector<16x128xf32>
    %c0 = arith.constant 0 : index
    %c0_1 = arith.constant 0 : index
    %2 = vector.load %arg6[%c0, %c0_1] : memref<16x1024xf32, #tpu.memory_space<vmem>>, vector<16x128xf32>
    tpu.vector_store %arg6[%c0, %c0_1], %0 {strides = array<i32>} : memref<16x1024xf32, #tpu.memory_space<vmem>>, vector<16x128xf32>,
    %c0_2 = arith.constant 0 : index
    %c384 = arith.constant 384 : index
    %3 = vector.load %arg6[%c0_2, %c384] : memref<16x1024xf32, #tpu.memory_space<vmem>>, vector<16x128xf32>
    tpu.vector_store %arg6[%c0_2, %c384], %1 {strides = array<i32>} : memref<16x1024xf32, #tpu.memory_space<vmem>>, vector<16x128xf32>,
    %c0_3 = arith.constant 0 : index
    %c0_4 = arith.constant 0 : index
    %c0_5 = arith.constant 0 : index
    %4 = vector.load %arg1[%c0_3, %c0_4, %c0_5] : memref<2x16x256xf32, #tpu.memory_space<vmem>>, vector<1x16x256xf32>
    %5 = vector.shape_cast %4 : vector<1x16x256xf32> to vector<16x256xf32>
    %c0_6 = arith.constant 0 : index
    %c128 = arith.constant 128 : index
    %6 = vector.load %arg6[%c0_6, %c128] : memref<16x1024xf32, #tpu.memory_space<vmem>>, vector<16x256xf32>
    tpu.vector_store %arg6[%c0_6, %c128], %5 {strides = array<i32>} : memref<16x1024xf32, #tpu.memory_space<vmem>>, vector<16x256xf32>,
    %c0_7 = arith.constant 0 : index
    %c512 = arith.constant 512 : index
    %7 = vector.load %arg6[%c0_7, %c512] : memref<16x1024xf32, #tpu.memory_space<vmem>>, vector<16x128xf32>
    tpu.vector_store %arg6[%c0_7, %c512], %0 {strides = array<i32>} : memref<16x1024xf32, #tpu.memory_space<vmem>>, vector<16x128xf32>,
    %c0_8 = arith.constant 0 : index
    %c896 = arith.constant 896 : index
    %8 = vector.load %arg6[%c0_8, %c896] : memref<16x1024xf32, #tpu.memory_space<vmem>>, vector<16x128xf32>
    tpu.vector_store %arg6[%c0_8, %c896], %1 {strides = array<i32>} : memref<16x1024xf32, #tpu.memory_space<vmem>>, vector<16x128xf32>,
    %c1 = arith.constant 1 : index
    %c0_9 = arith.constant 0 : index
    %c0_10 = arith.constant 0 : index
    %9 = vector.load %arg1[%c1, %c0_9, %c0_10] : memref<2x16x256xf32, #tpu.memory_space<vmem>>, vector<1x16x256xf32>
    %10 = vector.shape_cast %9 : vector<1x16x256xf32> to vector<16x256xf32>
    %c0_11 = arith.constant 0 : index
    %c640 = arith.constant 640 : index
    %11 = vector.load %arg6[%c0_11, %c640] : memref<16x1024xf32, #tpu.memory_space<vmem>>, vector<16x256xf32>
    tpu.vector_store %arg6[%c0_11, %c640], %10 {strides = array<i32>} : memref<16x1024xf32, #tpu.memory_space<vmem>>, vector<16x256xf32>,
    %c0_12 = arith.constant 0 : index
    %c0_13 = arith.constant 0 : index
    %12 = vector.load %arg2[%c0_12, %c0_13] : memref<2x256xf32, #tpu.memory_space<vmem>>, vector<1x256xf32>
    %c1_14 = arith.constant 1 : index
    %c0_15 = arith.constant 0 : index
    %13 = vector.load %arg2[%c1_14, %c0_15] : memref<2x256xf32, #tpu.memory_space<vmem>>, vector<1x256xf32>
    %c0_16 = arith.constant 0 : index
    %c111 = arith.constant 111 : index
    %14 = vector.load %arg6[%c0_16, %c111] : memref<16x1024xf32, #tpu.memory_space<vmem>>, vector<16x256xf32>
    %15 = vector.broadcast %12 : vector<1x256xf32> to vector<16x256xf32>
    %16 = arith.mulf %14, %15 : vector<16x256xf32>
    %17 = arith.truncf %16 : vector<16x256xf32> to vector<16x256xbf16>
    %c0_17 = arith.constant 0 : index
    %c0_18 = arith.constant 0 : index
    %18 = vector.load %arg7[%c0_17, %c0_18] : memref<144x512xbf16, #tpu.memory_space<vmem>>, vector<16x256xbf16>
    tpu.vector_store %arg7[%c0_17, %c0_18], %17 {strides = array<i32>} : memref<144x512xbf16, #tpu.memory_space<vmem>>, vector<16x256xbf16>,
    %c0_19 = arith.constant 0 : index
    %c623 = arith.constant 623 : index
    %19 = vector.load %arg6[%c0_19, %c623] : memref<16x1024xf32, #tpu.memory_space<vmem>>, vector<16x256xf32>
    %20 = vector.broadcast %12 : vector<1x256xf32> to vector<16x256xf32>
    %21 = arith.mulf %19, %20 : vector<16x256xf32>
    %22 = arith.truncf %21 : vector<16x256xf32> to vector<16x256xbf16>
    %c0_20 = arith.constant 0 : index
    %c256 = arith.constant 256 : index
    %23 = vector.load %arg7[%c0_20, %c256] : memref<144x512xbf16, #tpu.memory_space<vmem>>, vector<16x256xbf16>
    tpu.vector_store %arg7[%c0_20, %c256], %22 {strides = array<i32>} : memref<144x512xbf16, #tpu.memory_space<vmem>>, vector<16x256xbf16>,
    %c0_21 = arith.constant 0 : index
    %c112 = arith.constant 112 : index
    %24 = vector.load %arg6[%c0_21, %c112] : memref<16x1024xf32, #tpu.memory_space<vmem>>, vector<16x256xf32>
    %25 = arith.truncf %24 : vector<16x256xf32> to vector<16x256xbf16>
    %c16 = arith.constant 16 : index
    %c0_22 = arith.constant 0 : index
    %26 = vector.load %arg7[%c16, %c0_22] : memref<144x512xbf16, #tpu.memory_space<vmem>>, vector<16x256xbf16>
    tpu.vector_store %arg7[%c16, %c0_22], %25 {strides = array<i32>} : memref<144x512xbf16, #tpu.memory_space<vmem>>, vector<16x256xbf16>,
    %c0_23 = arith.constant 0 : index
    %c624 = arith.constant 624 : index
    %27 = vector.load %arg6[%c0_23, %c624] : memref<16x1024xf32, #tpu.memory_space<vmem>>, vector<16x256xf32>
    %28 = arith.truncf %27 : vector<16x256xf32> to vector<16x256xbf16>
    %c16_24 = arith.constant 16 : index
    %c256_25 = arith.constant 256 : index
    %29 = vector.load %arg7[%c16_24, %c256_25] : memref<144x512xbf16, #tpu.memory_space<vmem>>, vector<16x256xbf16>
    tpu.vector_store %arg7[%c16_24, %c256_25], %28 {strides = array<i32>} : memref<144x512xbf16, #tpu.memory_space<vmem>>, vector<16x256xbf16>,
    %c0_26 = arith.constant 0 : index
    %c113 = arith.constant 113 : index
    %30 = vector.load %arg6[%c0_26, %c113] : memref<16x1024xf32, #tpu.memory_space<vmem>>, vector<16x256xf32>
    %31 = vector.broadcast %13 : vector<1x256xf32> to vector<16x256xf32>
    %32 = arith.mulf %30, %31 : vector<16x256xf32>
    %33 = arith.truncf %32 : vector<16x256xf32> to vector<16x256xbf16>
    %c32 = arith.constant 32 : index
    %c0_27 = arith.constant 0 : index
    %34 = vector.load %arg7[%c32, %c0_27] : memref<144x512xbf16, #tpu.memory_space<vmem>>, vector<16x256xbf16>
    tpu.vector_store %arg7[%c32, %c0_27], %33 {strides = array<i32>} : memref<144x512xbf16, #tpu.memory_space<vmem>>, vector<16x256xbf16>,
    %c0_28 = arith.constant 0 : index
    %c625 = arith.constant 625 : index
    %35 = vector.load %arg6[%c0_28, %c625] : memref<16x1024xf32, #tpu.memory_space<vmem>>, vector<16x256xf32>
    %36 = vector.broadcast %13 : vector<1x256xf32> to vector<16x256xf32>
    %37 = arith.mulf %35, %36 : vector<16x256xf32>
    %38 = arith.truncf %37 : vector<16x256xf32> to vector<16x256xbf16>
    %c32_29 = arith.constant 32 : index
    %c256_30 = arith.constant 256 : index
    %39 = vector.load %arg7[%c32_29, %c256_30] : memref<144x512xbf16, #tpu.memory_space<vmem>>, vector<16x256xbf16>
    tpu.vector_store %arg7[%c32_29, %c256_30], %38 {strides = array<i32>} : memref<144x512xbf16, #tpu.memory_space<vmem>>, vector<16x256xbf16>,
    %c0_31 = arith.constant 0 : index
    %c127 = arith.constant 127 : index
    %40 = vector.load %arg6[%c0_31, %c127] : memref<16x1024xf32, #tpu.memory_space<vmem>>, vector<16x256xf32>
    %41 = vector.broadcast %12 : vector<1x256xf32> to vector<16x256xf32>
    %42 = arith.mulf %40, %41 : vector<16x256xf32>
    %43 = arith.truncf %42 : vector<16x256xf32> to vector<16x256xbf16>
    %c48 = arith.constant 48 : index
    %c0_32 = arith.constant 0 : index
    %44 = vector.load %arg7[%c48, %c0_32] : memref<144x512xbf16, #tpu.memory_space<vmem>>, vector<16x256xbf16>
    tpu.vector_store %arg7[%c48, %c0_32], %43 {strides = array<i32>} : memref<144x512xbf16, #tpu.memory_space<vmem>>, vector<16x256xbf16>,
    %c0_33 = arith.constant 0 : index
    %c639 = arith.constant 639 : index
    %45 = vector.load %arg6[%c0_33, %c639] : memref<16x1024xf32, #tpu.memory_space<vmem>>, vector<16x256xf32>
    %46 = vector.broadcast %12 : vector<1x256xf32> to vector<16x256xf32>
    %47 = arith.mulf %45, %46 : vector<16x256xf32>
    %48 = arith.truncf %47 : vector<16x256xf32> to vector<16x256xbf16>
    %c48_34 = arith.constant 48 : index
    %c256_35 = arith.constant 256 : index
    %49 = vector.load %arg7[%c48_34, %c256_35] : memref<144x512xbf16, #tpu.memory_space<vmem>>, vector<16x256xbf16>
    tpu.vector_store %arg7[%c48_34, %c256_35], %48 {strides = array<i32>} : memref<144x512xbf16, #tpu.memory_space<vmem>>, vector<16x256xbf16>,
    %c0_36 = arith.constant 0 : index
    %c128_37 = arith.constant 128 : index
    %50 = vector.load %arg6[%c0_36, %c128_37] : memref<16x1024xf32, #tpu.memory_space<vmem>>, vector<16x256xf32>
    %51 = arith.truncf %50 : vector<16x256xf32> to vector<16x256xbf16>
    %c64 = arith.constant 64 : index
    %c0_38 = arith.constant 0 : index
    %52 = vector.load %arg7[%c64, %c0_38] : memref<144x512xbf16, #tpu.memory_space<vmem>>, vector<16x256xbf16>
    tpu.vector_store %arg7[%c64, %c0_38], %51 {strides = array<i32>} : memref<144x512xbf16, #tpu.memory_space<vmem>>, vector<16x256xbf16>,
    %c0_39 = arith.constant 0 : index
    %c640_40 = arith.constant 640 : index
    %53 = vector.load %arg6[%c0_39, %c640_40] : memref<16x1024xf32, #tpu.memory_space<vmem>>, vector<16x256xf32>
    %54 = arith.truncf %53 : vector<16x256xf32> to vector<16x256xbf16>
    %c64_41 = arith.constant 64 : index
    %c256_42 = arith.constant 256 : index
    %55 = vector.load %arg7[%c64_41, %c256_42] : memref<144x512xbf16, #tpu.memory_space<vmem>>, vector<16x256xbf16>
    tpu.vector_store %arg7[%c64_41, %c256_42], %54 {strides = array<i32>} : memref<144x512xbf16, #tpu.memory_space<vmem>>, vector<16x256xbf16>,
    %c0_43 = arith.constant 0 : index
    %c129 = arith.constant 129 : index
    %56 = vector.load %arg6[%c0_43, %c129] : memref<16x1024xf32, #tpu.memory_space<vmem>>, vector<16x256xf32>
    %57 = vector.broadcast %13 : vector<1x256xf32> to vector<16x256xf32>
    %58 = arith.mulf %56, %57 : vector<16x256xf32>
    %59 = arith.truncf %58 : vector<16x256xf32> to vector<16x256xbf16>
    %c80 = arith.constant 80 : index
    %c0_44 = arith.constant 0 : index
    %60 = vector.load %arg7[%c80, %c0_44] : memref<144x512xbf16, #tpu.memory_space<vmem>>, vector<16x256xbf16>
    tpu.vector_store %arg7[%c80, %c0_44], %59 {strides = array<i32>} : memref<144x512xbf16, #tpu.memory_space<vmem>>, vector<16x256xbf16>,
    %c0_45 = arith.constant 0 : index
    %c641 = arith.constant 641 : index
    %61 = vector.load %arg6[%c0_45, %c641] : memref<16x1024xf32, #tpu.memory_space<vmem>>, vector<16x256xf32>
    %62 = vector.broadcast %13 : vector<1x256xf32> to vector<16x256xf32>
    %63 = arith.mulf %61, %62 : vector<16x256xf32>
    %64 = arith.truncf %63 : vector<16x256xf32> to vector<16x256xbf16>
    %c80_46 = arith.constant 80 : index
    %c256_47 = arith.constant 256 : index
    %65 = vector.load %arg7[%c80_46, %c256_47] : memref<144x512xbf16, #tpu.memory_space<vmem>>, vector<16x256xbf16>
    tpu.vector_store %arg7[%c80_46, %c256_47], %64 {strides = array<i32>} : memref<144x512xbf16, #tpu.memory_space<vmem>>, vector<16x256xbf16>,
    %c0_48 = arith.constant 0 : index
    %c143 = arith.constant 143 : index
    %66 = vector.load %arg6[%c0_48, %c143] : memref<16x1024xf32, #tpu.memory_space<vmem>>, vector<16x256xf32>
    %67 = vector.broadcast %12 : vector<1x256xf32> to vector<16x256xf32>
    %68 = arith.mulf %66, %67 : vector<16x256xf32>
    %69 = arith.truncf %68 : vector<16x256xf32> to vector<16x256xbf16>
    %c96 = arith.constant 96 : index
    %c0_49 = arith.constant 0 : index
    %70 = vector.load %arg7[%c96, %c0_49] : memref<144x512xbf16, #tpu.memory_space<vmem>>, vector<16x256xbf16>
    tpu.vector_store %arg7[%c96, %c0_49], %69 {strides = array<i32>} : memref<144x512xbf16, #tpu.memory_space<vmem>>, vector<16x256xbf16>,
    %c0_50 = arith.constant 0 : index
    %c655 = arith.constant 655 : index
    %71 = vector.load %arg6[%c0_50, %c655] : memref<16x1024xf32, #tpu.memory_space<vmem>>, vector<16x256xf32>
    %72 = vector.broadcast %12 : vector<1x256xf32> to vector<16x256xf32>
    %73 = arith.mulf %71, %72 : vector<16x256xf32>
    %74 = arith.truncf %73 : vector<16x256xf32> to vector<16x256xbf16>
    %c96_51 = arith.constant 96 : index
    %c256_52 = arith.constant 256 : index
    %75 = vector.load %arg7[%c96_51, %c256_52] : memref<144x512xbf16, #tpu.memory_space<vmem>>, vector<16x256xbf16>
    tpu.vector_store %arg7[%c96_51, %c256_52], %74 {strides = array<i32>} : memref<144x512xbf16, #tpu.memory_space<vmem>>, vector<16x256xbf16>,
    %c0_53 = arith.constant 0 : index
    %c144 = arith.constant 144 : index
    %76 = vector.load %arg6[%c0_53, %c144] : memref<16x1024xf32, #tpu.memory_space<vmem>>, vector<16x256xf32>
    %77 = arith.truncf %76 : vector<16x256xf32> to vector<16x256xbf16>
    %c112_54 = arith.constant 112 : index
    %c0_55 = arith.constant 0 : index
    %78 = vector.load %arg7[%c112_54, %c0_55] : memref<144x512xbf16, #tpu.memory_space<vmem>>, vector<16x256xbf16>
    tpu.vector_store %arg7[%c112_54, %c0_55], %77 {strides = array<i32>} : memref<144x512xbf16, #tpu.memory_space<vmem>>, vector<16x256xbf16>,
    %c0_56 = arith.constant 0 : index
    %c656 = arith.constant 656 : index
    %79 = vector.load %arg6[%c0_56, %c656] : memref<16x1024xf32, #tpu.memory_space<vmem>>, vector<16x256xf32>
    %80 = arith.truncf %79 : vector<16x256xf32> to vector<16x256xbf16>
    %c112_57 = arith.constant 112 : index
    %c256_58 = arith.constant 256 : index
    %81 = vector.load %arg7[%c112_57, %c256_58] : memref<144x512xbf16, #tpu.memory_space<vmem>>, vector<16x256xbf16>
    tpu.vector_store %arg7[%c112_57, %c256_58], %80 {strides = array<i32>} : memref<144x512xbf16, #tpu.memory_space<vmem>>, vector<16x256xbf16>,
    %c0_59 = arith.constant 0 : index
    %c145 = arith.constant 145 : index
    %82 = vector.load %arg6[%c0_59, %c145] : memref<16x1024xf32, #tpu.memory_space<vmem>>, vector<16x256xf32>
    %83 = vector.broadcast %13 : vector<1x256xf32> to vector<16x256xf32>
    %84 = arith.mulf %82, %83 : vector<16x256xf32>
    %85 = arith.truncf %84 : vector<16x256xf32> to vector<16x256xbf16>
    %c128_60 = arith.constant 128 : index
    %c0_61 = arith.constant 0 : index
    %86 = vector.load %arg7[%c128_60, %c0_61] : memref<144x512xbf16, #tpu.memory_space<vmem>>, vector<16x256xbf16>
    tpu.vector_store %arg7[%c128_60, %c0_61], %85 {strides = array<i32>} : memref<144x512xbf16, #tpu.memory_space<vmem>>, vector<16x256xbf16>,
    %c0_62 = arith.constant 0 : index
    %c657 = arith.constant 657 : index
    %87 = vector.load %arg6[%c0_62, %c657] : memref<16x1024xf32, #tpu.memory_space<vmem>>, vector<16x256xf32>
    %88 = vector.broadcast %13 : vector<1x256xf32> to vector<16x256xf32>
    %89 = arith.mulf %87, %88 : vector<16x256xf32>
    %90 = arith.truncf %89 : vector<16x256xf32> to vector<16x256xbf16>
    %c128_63 = arith.constant 128 : index
    %c256_64 = arith.constant 256 : index
    %91 = vector.load %arg7[%c128_63, %c256_64] : memref<144x512xbf16, #tpu.memory_space<vmem>>, vector<16x256xbf16>
    tpu.vector_store %arg7[%c128_63, %c256_64], %90 {strides = array<i32>} : memref<144x512xbf16, #tpu.memory_space<vmem>>, vector<16x256xbf16>,
    %c0_65 = arith.constant 0 : index
    %c0_66 = arith.constant 0 : index
    %c0_67 = arith.constant 0 : index
    %92 = vector.load %arg3[%c0_65, %c0_66, %c0_67] : memref<2x16x144xbf16, #tpu.memory_space<vmem>>, vector<1x16x144xbf16>
    %93 = vector.shape_cast %92 : vector<1x16x144xbf16> to vector<16x144xbf16>
    %c0_68 = arith.constant 0 : index
    %c0_69 = arith.constant 0 : index
    %94 = vector.load %arg7[%c0_68, %c0_69] : memref<144x512xbf16, #tpu.memory_space<vmem>>, vector<144x512xbf16>
    %cst_70 = arith.constant dense<0.000000e+00> : vector<16x512xf32>
    %95 = tpu.matmul %93, %94, %cst_70 {dimension_numbers = #tpu.dot_dimension_numbers<[1], [0], [0], [1], [0, 0, 1, 1], [], []>} : vector<16x144xbf16>, vector<144x512xbf16>, vector<16x512xf32> -> vector<16x512xf32>
    %c0_71 = arith.constant 0 : index
    %c0_72 = arith.constant 0 : index
    %c0_73 = arith.constant 0 : index
    %96 = vector.load %arg4[%c0_71, %c0_72, %c0_73] : memref<2x16x1xf32, #tpu.memory_space<vmem>>, vector<1x16x1xf32>
    %97 = vector.shape_cast %96 : vector<1x16x1xf32> to vector<16x1xf32>
    %98 = vector.broadcast %97 : vector<16x1xf32> to vector<16x512xf32>
    %99 = arith.addf %95, %98 : vector<16x512xf32>
    %cst_74 = arith.constant 0.000000e+00 : f32
    %100 = vector.broadcast %cst_74 : f32 to vector<16x512xf32>
    %101 = arith.maximumf %99, %100 : vector<16x512xf32>
    %102 = vector.extract_strided_slice %101 {offsets = [0, 0], sizes = [16, 256], strides = [1, 1]} : vector<16x512xf32> to vector<16x256xf32>
    %c0_75 = arith.constant 0 : index
    %c0_76 = arith.constant 0 : index
    %c0_77 = arith.constant 0 : index
    %c0_78 = arith.constant 0 : index
    %103 = vector.load %arg5[%c0_75, %c0_76, %c0_77, %c0_78] : memref<2x2x16x256xf32, #tpu.memory_space<vmem>>, vector<1x1x16x256xf32>
    %104 = vector.shape_cast %103 : vector<1x1x16x256xf32> to vector<16x256xf32>
    %105 = vector.shape_cast %102 : vector<16x256xf32> to vector<1x1x16x256xf32>
    tpu.vector_store %arg5[%c0_75, %c0_76, %c0_77, %c0_78], %105 {strides = array<i32>} : memref<2x2x16x256xf32, #tpu.memory_space<vmem>>, vector<1x1x16x256xf32>,
    %106 = vector.extract_strided_slice %101 {offsets = [0, 0], sizes = [16, 256], strides = [1, 1]} : vector<16x512xf32> to vector<16x256xf32>
    %c0_79 = arith.constant 0 : index
    %c128_80 = arith.constant 128 : index
    %107 = vector.load %arg6[%c0_79, %c128_80] : memref<16x1024xf32, #tpu.memory_space<vmem>>, vector<16x256xf32>
    tpu.vector_store %arg6[%c0_79, %c128_80], %106 {strides = array<i32>} : memref<16x1024xf32, #tpu.memory_space<vmem>>, vector<16x256xf32>,
    %108 = vector.extract_strided_slice %101 {offsets = [0, 256], sizes = [16, 256], strides = [1, 1]} : vector<16x512xf32> to vector<16x256xf32>
    %c0_81 = arith.constant 0 : index
    %c1_82 = arith.constant 1 : index
    %c0_83 = arith.constant 0 : index
    %c0_84 = arith.constant 0 : index
    %109 = vector.load %arg5[%c0_81, %c1_82, %c0_83, %c0_84] : memref<2x2x16x256xf32, #tpu.memory_space<vmem>>, vector<1x1x16x256xf32>
    %110 = vector.shape_cast %109 : vector<1x1x16x256xf32> to vector<16x256xf32>
    %111 = vector.shape_cast %108 : vector<16x256xf32> to vector<1x1x16x256xf32>
    tpu.vector_store %arg5[%c0_81, %c1_82, %c0_83, %c0_84], %111 {strides = array<i32>} : memref<2x2x16x256xf32, #tpu.memory_space<vmem>>, vector<1x1x16x256xf32>,
    %112 = vector.extract_strided_slice %101 {offsets = [0, 256], sizes = [16, 256], strides = [1, 1]} : vector<16x512xf32> to vector<16x256xf32>
    %c0_85 = arith.constant 0 : index
    %c640_86 = arith.constant 640 : index
    %113 = vector.load %arg6[%c0_85, %c640_86] : memref<16x1024xf32, #tpu.memory_space<vmem>>, vector<16x256xf32>
    tpu.vector_store %arg6[%c0_85, %c640_86], %112 {strides = array<i32>} : memref<16x1024xf32, #tpu.memory_space<vmem>>, vector<16x256xf32>,
    %c0_87 = arith.constant 0 : index
    %c111_88 = arith.constant 111 : index
    %114 = vector.load %arg6[%c0_87, %c111_88] : memref<16x1024xf32, #tpu.memory_space<vmem>>, vector<16x256xf32>
    %115 = vector.broadcast %12 : vector<1x256xf32> to vector<16x256xf32>
    %116 = arith.mulf %114, %115 : vector<16x256xf32>
    %117 = arith.truncf %116 : vector<16x256xf32> to vector<16x256xbf16>
    %c0_89 = arith.constant 0 : index
    %c0_90 = arith.constant 0 : index
    %118 = vector.load %arg7[%c0_89, %c0_90] : memref<144x512xbf16, #tpu.memory_space<vmem>>, vector<16x256xbf16>
    tpu.vector_store %arg7[%c0_89, %c0_90], %117 {strides = array<i32>} : memref<144x512xbf16, #tpu.memory_space<vmem>>, vector<16x256xbf16>,
    %c0_91 = arith.constant 0 : index
    %c623_92 = arith.constant 623 : index
    %119 = vector.load %arg6[%c0_91, %c623_92] : memref<16x1024xf32, #tpu.memory_space<vmem>>, vector<16x256xf32>
    %120 = vector.broadcast %12 : vector<1x256xf32> to vector<16x256xf32>
    %121 = arith.mulf %119, %120 : vector<16x256xf32>
    %122 = arith.truncf %121 : vector<16x256xf32> to vector<16x256xbf16>
    %c0_93 = arith.constant 0 : index
    %c256_94 = arith.constant 256 : index
    %123 = vector.load %arg7[%c0_93, %c256_94] : memref<144x512xbf16, #tpu.memory_space<vmem>>, vector<16x256xbf16>
    tpu.vector_store %arg7[%c0_93, %c256_94], %122 {strides = array<i32>} : memref<144x512xbf16, #tpu.memory_space<vmem>>, vector<16x256xbf16>,
    %c0_95 = arith.constant 0 : index
    %c112_96 = arith.constant 112 : index
    %124 = vector.load %arg6[%c0_95, %c112_96] : memref<16x1024xf32, #tpu.memory_space<vmem>>, vector<16x256xf32>
    %125 = arith.truncf %124 : vector<16x256xf32> to vector<16x256xbf16>
    %c16_97 = arith.constant 16 : index
    %c0_98 = arith.constant 0 : index
    %126 = vector.load %arg7[%c16_97, %c0_98] : memref<144x512xbf16, #tpu.memory_space<vmem>>, vector<16x256xbf16>
    tpu.vector_store %arg7[%c16_97, %c0_98], %125 {strides = array<i32>} : memref<144x512xbf16, #tpu.memory_space<vmem>>, vector<16x256xbf16>,
    %c0_99 = arith.constant 0 : index
    %c624_100 = arith.constant 624 : index
    %127 = vector.load %arg6[%c0_99, %c624_100] : memref<16x1024xf32, #tpu.memory_space<vmem>>, vector<16x256xf32>
    %128 = arith.truncf %127 : vector<16x256xf32> to vector<16x256xbf16>
    %c16_101 = arith.constant 16 : index
    %c256_102 = arith.constant 256 : index
    %129 = vector.load %arg7[%c16_101, %c256_102] : memref<144x512xbf16, #tpu.memory_space<vmem>>, vector<16x256xbf16>
    tpu.vector_store %arg7[%c16_101, %c256_102], %128 {strides = array<i32>} : memref<144x512xbf16, #tpu.memory_space<vmem>>, vector<16x256xbf16>,
    %c0_103 = arith.constant 0 : index
    %c113_104 = arith.constant 113 : index
    %130 = vector.load %arg6[%c0_103, %c113_104] : memref<16x1024xf32, #tpu.memory_space<vmem>>, vector<16x256xf32>
    %131 = vector.broadcast %13 : vector<1x256xf32> to vector<16x256xf32>
    %132 = arith.mulf %130, %131 : vector<16x256xf32>
    %133 = arith.truncf %132 : vector<16x256xf32> to vector<16x256xbf16>
    %c32_105 = arith.constant 32 : index
    %c0_106 = arith.constant 0 : index
    %134 = vector.load %arg7[%c32_105, %c0_106] : memref<144x512xbf16, #tpu.memory_space<vmem>>, vector<16x256xbf16>
    tpu.vector_store %arg7[%c32_105, %c0_106], %133 {strides = array<i32>} : memref<144x512xbf16, #tpu.memory_space<vmem>>, vector<16x256xbf16>,
    %c0_107 = arith.constant 0 : index
    %c625_108 = arith.constant 625 : index
    %135 = vector.load %arg6[%c0_107, %c625_108] : memref<16x1024xf32, #tpu.memory_space<vmem>>, vector<16x256xf32>
    %136 = vector.broadcast %13 : vector<1x256xf32> to vector<16x256xf32>
    %137 = arith.mulf %135, %136 : vector<16x256xf32>
    %138 = arith.truncf %137 : vector<16x256xf32> to vector<16x256xbf16>
    %c32_109 = arith.constant 32 : index
    %c256_110 = arith.constant 256 : index
    %139 = vector.load %arg7[%c32_109, %c256_110] : memref<144x512xbf16, #tpu.memory_space<vmem>>, vector<16x256xbf16>
    tpu.vector_store %arg7[%c32_109, %c256_110], %138 {strides = array<i32>} : memref<144x512xbf16, #tpu.memory_space<vmem>>, vector<16x256xbf16>,
    %c0_111 = arith.constant 0 : index
    %c127_112 = arith.constant 127 : index
    %140 = vector.load %arg6[%c0_111, %c127_112] : memref<16x1024xf32, #tpu.memory_space<vmem>>, vector<16x256xf32>
    %141 = vector.broadcast %12 : vector<1x256xf32> to vector<16x256xf32>
    %142 = arith.mulf %140, %141 : vector<16x256xf32>
    %143 = arith.truncf %142 : vector<16x256xf32> to vector<16x256xbf16>
    %c48_113 = arith.constant 48 : index
    %c0_114 = arith.constant 0 : index
    %144 = vector.load %arg7[%c48_113, %c0_114] : memref<144x512xbf16, #tpu.memory_space<vmem>>, vector<16x256xbf16>
    tpu.vector_store %arg7[%c48_113, %c0_114], %143 {strides = array<i32>} : memref<144x512xbf16, #tpu.memory_space<vmem>>, vector<16x256xbf16>,
    %c0_115 = arith.constant 0 : index
    %c639_116 = arith.constant 639 : index
    %145 = vector.load %arg6[%c0_115, %c639_116] : memref<16x1024xf32, #tpu.memory_space<vmem>>, vector<16x256xf32>
    %146 = vector.broadcast %12 : vector<1x256xf32> to vector<16x256xf32>
    %147 = arith.mulf %145, %146 : vector<16x256xf32>
    %148 = arith.truncf %147 : vector<16x256xf32> to vector<16x256xbf16>
    %c48_117 = arith.constant 48 : index
    %c256_118 = arith.constant 256 : index
    %149 = vector.load %arg7[%c48_117, %c256_118] : memref<144x512xbf16, #tpu.memory_space<vmem>>, vector<16x256xbf16>
    tpu.vector_store %arg7[%c48_117, %c256_118], %148 {strides = array<i32>} : memref<144x512xbf16, #tpu.memory_space<vmem>>, vector<16x256xbf16>,
    %c0_119 = arith.constant 0 : index
    %c128_120 = arith.constant 128 : index
    %150 = vector.load %arg6[%c0_119, %c128_120] : memref<16x1024xf32, #tpu.memory_space<vmem>>, vector<16x256xf32>
    %151 = arith.truncf %150 : vector<16x256xf32> to vector<16x256xbf16>
    %c64_121 = arith.constant 64 : index
    %c0_122 = arith.constant 0 : index
    %152 = vector.load %arg7[%c64_121, %c0_122] : memref<144x512xbf16, #tpu.memory_space<vmem>>, vector<16x256xbf16>
    tpu.vector_store %arg7[%c64_121, %c0_122], %151 {strides = array<i32>} : memref<144x512xbf16, #tpu.memory_space<vmem>>, vector<16x256xbf16>,
    %c0_123 = arith.constant 0 : index
    %c640_124 = arith.constant 640 : index
    %153 = vector.load %arg6[%c0_123, %c640_124] : memref<16x1024xf32, #tpu.memory_space<vmem>>, vector<16x256xf32>
    %154 = arith.truncf %153 : vector<16x256xf32> to vector<16x256xbf16>
    %c64_125 = arith.constant 64 : index
    %c256_126 = arith.constant 256 : index
    %155 = vector.load %arg7[%c64_125, %c256_126] : memref<144x512xbf16, #tpu.memory_space<vmem>>, vector<16x256xbf16>
    tpu.vector_store %arg7[%c64_125, %c256_126], %154 {strides = array<i32>} : memref<144x512xbf16, #tpu.memory_space<vmem>>, vector<16x256xbf16>,
    %c0_127 = arith.constant 0 : index
    %c129_128 = arith.constant 129 : index
    %156 = vector.load %arg6[%c0_127, %c129_128] : memref<16x1024xf32, #tpu.memory_space<vmem>>, vector<16x256xf32>
    %157 = vector.broadcast %13 : vector<1x256xf32> to vector<16x256xf32>
    %158 = arith.mulf %156, %157 : vector<16x256xf32>
    %159 = arith.truncf %158 : vector<16x256xf32> to vector<16x256xbf16>
    %c80_129 = arith.constant 80 : index
    %c0_130 = arith.constant 0 : index
    %160 = vector.load %arg7[%c80_129, %c0_130] : memref<144x512xbf16, #tpu.memory_space<vmem>>, vector<16x256xbf16>
    tpu.vector_store %arg7[%c80_129, %c0_130], %159 {strides = array<i32>} : memref<144x512xbf16, #tpu.memory_space<vmem>>, vector<16x256xbf16>,
    %c0_131 = arith.constant 0 : index
    %c641_132 = arith.constant 641 : index
    %161 = vector.load %arg6[%c0_131, %c641_132] : memref<16x1024xf32, #tpu.memory_space<vmem>>, vector<16x256xf32>
    %162 = vector.broadcast %13 : vector<1x256xf32> to vector<16x256xf32>
    %163 = arith.mulf %161, %162 : vector<16x256xf32>
    %164 = arith.truncf %163 : vector<16x256xf32> to vector<16x256xbf16>
    %c80_133 = arith.constant 80 : index
    %c256_134 = arith.constant 256 : index
    %165 = vector.load %arg7[%c80_133, %c256_134] : memref<144x512xbf16, #tpu.memory_space<vmem>>, vector<16x256xbf16>
    tpu.vector_store %arg7[%c80_133, %c256_134], %164 {strides = array<i32>} : memref<144x512xbf16, #tpu.memory_space<vmem>>, vector<16x256xbf16>,
    %c0_135 = arith.constant 0 : index
    %c143_136 = arith.constant 143 : index
    %166 = vector.load %arg6[%c0_135, %c143_136] : memref<16x1024xf32, #tpu.memory_space<vmem>>, vector<16x256xf32>
    %167 = vector.broadcast %12 : vector<1x256xf32> to vector<16x256xf32>
    %168 = arith.mulf %166, %167 : vector<16x256xf32>
    %169 = arith.truncf %168 : vector<16x256xf32> to vector<16x256xbf16>
    %c96_137 = arith.constant 96 : index
    %c0_138 = arith.constant 0 : index
    %170 = vector.load %arg7[%c96_137, %c0_138] : memref<144x512xbf16, #tpu.memory_space<vmem>>, vector<16x256xbf16>
    tpu.vector_store %arg7[%c96_137, %c0_138], %169 {strides = array<i32>} : memref<144x512xbf16, #tpu.memory_space<vmem>>, vector<16x256xbf16>,
    %c0_139 = arith.constant 0 : index
    %c655_140 = arith.constant 655 : index
    %171 = vector.load %arg6[%c0_139, %c655_140] : memref<16x1024xf32, #tpu.memory_space<vmem>>, vector<16x256xf32>
    %172 = vector.broadcast %12 : vector<1x256xf32> to vector<16x256xf32>
    %173 = arith.mulf %171, %172 : vector<16x256xf32>
    %174 = arith.truncf %173 : vector<16x256xf32> to vector<16x256xbf16>
    %c96_141 = arith.constant 96 : index
    %c256_142 = arith.constant 256 : index
    %175 = vector.load %arg7[%c96_141, %c256_142] : memref<144x512xbf16, #tpu.memory_space<vmem>>, vector<16x256xbf16>
    tpu.vector_store %arg7[%c96_141, %c256_142], %174 {strides = array<i32>} : memref<144x512xbf16, #tpu.memory_space<vmem>>, vector<16x256xbf16>,
    %c0_143 = arith.constant 0 : index
    %c144_144 = arith.constant 144 : index
    %176 = vector.load %arg6[%c0_143, %c144_144] : memref<16x1024xf32, #tpu.memory_space<vmem>>, vector<16x256xf32>
    %177 = arith.truncf %176 : vector<16x256xf32> to vector<16x256xbf16>
    %c112_145 = arith.constant 112 : index
    %c0_146 = arith.constant 0 : index
    %178 = vector.load %arg7[%c112_145, %c0_146] : memref<144x512xbf16, #tpu.memory_space<vmem>>, vector<16x256xbf16>
    tpu.vector_store %arg7[%c112_145, %c0_146], %177 {strides = array<i32>} : memref<144x512xbf16, #tpu.memory_space<vmem>>, vector<16x256xbf16>,
    %c0_147 = arith.constant 0 : index
    %c656_148 = arith.constant 656 : index
    %179 = vector.load %arg6[%c0_147, %c656_148] : memref<16x1024xf32, #tpu.memory_space<vmem>>, vector<16x256xf32>
    %180 = arith.truncf %179 : vector<16x256xf32> to vector<16x256xbf16>
    %c112_149 = arith.constant 112 : index
    %c256_150 = arith.constant 256 : index
    %181 = vector.load %arg7[%c112_149, %c256_150] : memref<144x512xbf16, #tpu.memory_space<vmem>>, vector<16x256xbf16>
    tpu.vector_store %arg7[%c112_149, %c256_150], %180 {strides = array<i32>} : memref<144x512xbf16, #tpu.memory_space<vmem>>, vector<16x256xbf16>,
    %c0_151 = arith.constant 0 : index
    %c145_152 = arith.constant 145 : index
    %182 = vector.load %arg6[%c0_151, %c145_152] : memref<16x1024xf32, #tpu.memory_space<vmem>>, vector<16x256xf32>
    %183 = vector.broadcast %13 : vector<1x256xf32> to vector<16x256xf32>
    %184 = arith.mulf %182, %183 : vector<16x256xf32>
    %185 = arith.truncf %184 : vector<16x256xf32> to vector<16x256xbf16>
    %c128_153 = arith.constant 128 : index
    %c0_154 = arith.constant 0 : index
    %186 = vector.load %arg7[%c128_153, %c0_154] : memref<144x512xbf16, #tpu.memory_space<vmem>>, vector<16x256xbf16>
    tpu.vector_store %arg7[%c128_153, %c0_154], %185 {strides = array<i32>} : memref<144x512xbf16, #tpu.memory_space<vmem>>, vector<16x256xbf16>,
    %c0_155 = arith.constant 0 : index
    %c657_156 = arith.constant 657 : index
    %187 = vector.load %arg6[%c0_155, %c657_156] : memref<16x1024xf32, #tpu.memory_space<vmem>>, vector<16x256xf32>
    %188 = vector.broadcast %13 : vector<1x256xf32> to vector<16x256xf32>
    %189 = arith.mulf %187, %188 : vector<16x256xf32>
    %190 = arith.truncf %189 : vector<16x256xf32> to vector<16x256xbf16>
    %c128_157 = arith.constant 128 : index
    %c256_158 = arith.constant 256 : index
    %191 = vector.load %arg7[%c128_157, %c256_158] : memref<144x512xbf16, #tpu.memory_space<vmem>>, vector<16x256xbf16>
    tpu.vector_store %arg7[%c128_157, %c256_158], %190 {strides = array<i32>} : memref<144x512xbf16, #tpu.memory_space<vmem>>, vector<16x256xbf16>,
    %c1_159 = arith.constant 1 : index
    %c0_160 = arith.constant 0 : index
    %c0_161 = arith.constant 0 : index
    %192 = vector.load %arg3[%c1_159, %c0_160, %c0_161] : memref<2x16x144xbf16, #tpu.memory_space<vmem>>, vector<1x16x144xbf16>
    %193 = vector.shape_cast %192 : vector<1x16x144xbf16> to vector<16x144xbf16>
    %c0_162 = arith.constant 0 : index
    %c0_163 = arith.constant 0 : index
    %194 = vector.load %arg7[%c0_162, %c0_163] : memref<144x512xbf16, #tpu.memory_space<vmem>>, vector<144x512xbf16>
    %cst_164 = arith.constant dense<0.000000e+00> : vector<16x512xf32>
    %195 = tpu.matmul %193, %194, %cst_164 {dimension_numbers = #tpu.dot_dimension_numbers<[1], [0], [0], [1], [0, 0, 1, 1], [], []>} : vector<16x144xbf16>, vector<144x512xbf16>, vector<16x512xf32> -> vector<16x512xf32>
    %c1_165 = arith.constant 1 : index
    %c0_166 = arith.constant 0 : index
    %c0_167 = arith.constant 0 : index
    %196 = vector.load %arg4[%c1_165, %c0_166, %c0_167] : memref<2x16x1xf32, #tpu.memory_space<vmem>>, vector<1x16x1xf32>
    %197 = vector.shape_cast %196 : vector<1x16x1xf32> to vector<16x1xf32>
    %198 = vector.broadcast %197 : vector<16x1xf32> to vector<16x512xf32>
    %199 = arith.addf %195, %198 : vector<16x512xf32>
    %cst_168 = arith.constant 0.000000e+00 : f32
    %200 = vector.broadcast %cst_168 : f32 to vector<16x512xf32>
    %201 = arith.maximumf %199, %200 : vector<16x512xf32>
    %202 = vector.extract_strided_slice %201 {offsets = [0, 0], sizes = [16, 256], strides = [1, 1]} : vector<16x512xf32> to vector<16x256xf32>
    %c1_169 = arith.constant 1 : index
    %c0_170 = arith.constant 0 : index
    %c0_171 = arith.constant 0 : index
    %c0_172 = arith.constant 0 : index
    %203 = vector.load %arg5[%c1_169, %c0_170, %c0_171, %c0_172] : memref<2x2x16x256xf32, #tpu.memory_space<vmem>>, vector<1x1x16x256xf32>
    %204 = vector.shape_cast %203 : vector<1x1x16x256xf32> to vector<16x256xf32>
    %205 = vector.shape_cast %202 : vector<16x256xf32> to vector<1x1x16x256xf32>
    tpu.vector_store %arg5[%c1_169, %c0_170, %c0_171, %c0_172], %205 {strides = array<i32>} : memref<2x2x16x256xf32, #tpu.memory_space<vmem>>, vector<1x1x16x256xf32>,
    %206 = vector.extract_strided_slice %201 {offsets = [0, 256], sizes = [16, 256], strides = [1, 1]} : vector<16x512xf32> to vector<16x256xf32>
    %c1_173 = arith.constant 1 : index
    %c1_174 = arith.constant 1 : index
    %c0_175 = arith.constant 0 : index
    %c0_176 = arith.constant 0 : index
    %207 = vector.load %arg5[%c1_173, %c1_174, %c0_175, %c0_176] : memref<2x2x16x256xf32, #tpu.memory_space<vmem>>, vector<1x1x16x256xf32>
    %208 = vector.shape_cast %207 : vector<1x1x16x256xf32> to vector<16x256xf32>
    %209 = vector.shape_cast %206 : vector<16x256xf32> to vector<1x1x16x256xf32>
    tpu.vector_store %arg5[%c1_173, %c1_174, %c0_175, %c0_176], %209 {strides = array<i32>} : memref<2x2x16x256xf32, #tpu.memory_space<vmem>>, vector<1x1x16x256xf32>,
    return
  }
  func.func @transform_0(%arg0: i32) -> (i32, i32, i32) {
    %c0_i32 = arith.constant 0 : i32
    %c0_i32_0 = arith.constant 0 : i32
    %c0_i32_1 = arith.constant 0 : i32
    return %arg0, %c0_i32, %c0_i32_0 : i32, i32, i32
  }
  func.func @transform_1(%arg0: i32) -> (i32, i32) {
    %c0_i32 = arith.constant 0 : i32
    %c0_i32_0 = arith.constant 0 : i32
    %c0_i32_1 = arith.constant 0 : i32
    return %c0_i32, %c0_i32_0 : i32, i32
  }
  func.func @transform_2(%arg0: i32) -> (i32, i32, i32) {
    %c0_i32 = arith.constant 0 : i32
    %c0_i32_0 = arith.constant 0 : i32
    %c0_i32_1 = arith.constant 0 : i32
    %c0_i32_2 = arith.constant 0 : i32
    return %c0_i32, %c0_i32_0, %c0_i32_1 : i32, i32, i32
  }
  func.func @transform_3(%arg0: i32) -> (i32, i32, i32) {
    %c0_i32 = arith.constant 0 : i32
    %c0_i32_0 = arith.constant 0 : i32
    %c0_i32_1 = arith.constant 0 : i32
    %c0_i32_2 = arith.constant 0 : i32
    return %c0_i32, %c0_i32_0, %c0_i32_1 : i32, i32, i32
  }
  func.func @transform_4(%arg0: i32) -> (i32, i32, i32, i32) {
    %c0_i32 = arith.constant 0 : i32
    %c0_i32_0 = arith.constant 0 : i32
    %c0_i32_1 = arith.constant 0 : i32
    %c0_i32_2 = arith.constant 0 : i32
    return %c0_i32, %arg0, %c0_i32_0, %c0_i32_1 : i32, i32, i32, i32
  }
}

</mosaic_0001>

<bundles_post_ra>
// kernel: _res_block_pallas.1
= control target key start
LH: loop header
LB: loop body
LE: loop exit
PB: predicated region body
PF: predicated region fallthrough
CT: control target
= control target key end

     0   :  { %s4296_s0 = inlined_call_operand.hbm [shape: f32[4,16,256], index: 0, kind: input, shape index: {}]   ;;  %s4297_s1 = inlined_call_operand.hbm [shape: f32[2,256], index: 1, kind: input, shape index: {}]   ;;  %s4298_s2 = inlined_call_operand.vmem [shape: bf16[2,16,144], index: 2, kind: input, shape index: {}]   ;;  %s4299_s3 = inlined_call_operand.vmem [shape: f32[2,16,1], index: 3, kind: input, shape index: {}]   ;;  %s4300_s4 = inlined_call_operand.hbm [shape: f32[2,4,16,256], index: 4, kind: output, shape index: {}]  }
   0x1   :  { %4301 = sst [smem:[#allocation15_spill]] %s4297_s1 }
   0x2   :  { %9 = vsyncpa [#allocation5], 0 }
   0x3   :  { %11 = vsyncpa [#allocation5 + $0x1], 0 }
   0x4   :  { %12 = vsyncpa [#allocation8], 0 }
   0x5   :  { %13 = vsyncpa [#allocation6], 0 }
   0x6   :  { %15 = vsyncpa [#allocation6 + $0x1], 0  ;;  %s3141_s15 = smov 0   ;;  %s3143_s16 = smov 0  }
   0x7   :  { %s3145_s17 = smov 0   ;;  %s3147_s18 = smov 0  }
   0x8 LB: > { %s3162_s19 = sadd.s32 4294967295, %s3093_s18   ;;  %s2475_s20 = sadd.s32 4294967294, %s3093_s18   ;;  %s3093_s18 = sphi %s3147_s18, %s4313_s18   ;;  %s3089_s17 = sphi %s3145_s17, %s4312_s17   ;;  %s3085_s16 = sphi %s3143_s16, %s4311_s16   ;;  %s3081_s15 = sphi %s3141_s15, %s4310_s15  }
   0x9   : > { %s3166_s21 = sadd.s32 1, %s3093_s18   ;;  %s28_s22 = sadd.s32 1, %s3089_s17 }
   0xa   : > { %s25_s23 = ssub.s32 %s3093_s18, %s3166_s21  ;;  %p35_p0 = scmp.ne.s32.totalorder %s3089_s17, %s3085_s16 }
   0xb   : > { %p26_p1 = scmp.eq.s32.totalorder %s25_s23, 0  ;;  %p36_p2 = scmp.eq.s32.totalorder %s3093_s18, 0 }
   0xc   : > { %p41_p3 = scmp.ne.s32.totalorder %s3085_s16, %s3081_s15  ;;  %p42_p4 = scmp.eq.s32.totalorder %s3162_s19, 0 }
   0xd   : > { %s3178_s24 = scalar_select %p26_p1, %s3089_s17, %s28_s22  }
   0xe   : > { %p3180_p5 = por %p36_p2, %p35_p0  ;;  %p3186_p6 = por %p42_p4, %p41_p3 }
   0xf   : > { %p128_p7 = scmp.eq.s32.totalorder %s3162_s19, 1  ;;  %p134_p8 = scmp.eq.s32.totalorder %s2475_s20, 1 }
  0x10   : > { %p2476_p9 = scmp.ge.s32.totalorder %s3093_s18, 1  ;;  %p141_p10 = scmp.lt.s32.totalorder %s3093_s18, 3 }
  0x11   : > { %p3193_p11 = por %p128_p7, %p35_p0  ;;  %p3197_p12 = por %p134_p8, %p41_p3 }
  0x12   : > { %p3201_p13 = pnand %p2476_p9, %p141_p10  ;;  %s4307_s1 = sld [smem:[#allocation15_spill]] }
  0x13   : > { %s3095_s7 = smov [#allocation7]   ;;  %p2932_p3 = scmp.lt.s32.totalorder %s3093_s18, 2 }
  0x14   : > { %p2919_p1 = pneg %p3201_p13  ;;  %s155_s8 = sshll.u32 %s3095_s7, 4  ;;  %s156_s8 = int_to_ptr.vmem [resolvable:$true] %s155_s8 }
  0x15   : > { %s172_s9 = sand.u32 1, %s3089_s17   ;;  %p3217_p7 = pnand %p2932_p3, %p3180_p5 }
  0x16   : > { %p2920_p2 = pnand %p2919_p1, %p42_p4  ;;  %s2479_s11 = sshll.u32 %s172_s9, 6 }
  0x17   : > { %s2826_s12 = sshll.u32 %s3093_s18, 6  ;;  %s176_s23 = scalar_lea.vmem [#allocation4], %s2479_s11 }
  0x18   : > { %s153_s6 = sshll.u32 %s4307_s1, 4  ;;  %s182_s20 = scalar_lea.hbm %s4296_s0, %s2826_s12  ;;  %s154_s6 = int_to_ptr.hbm [resolvable:$true] %s153_s6 }
  0x19   : > { %2922 = dma.hbm_to_vmem [thread:$0]  (!%p2920_p2), %s154_s6, 64, %s156_s8, [#allocation8]  }
  0x1a   : > { %s183_s22 = sshll.u32 %s182_s20, 4  ;;  %s185_s30 = sshll.u32 %s176_s23, 4  ;;  %s184_s22 = int_to_ptr.hbm [resolvable:$true] %s183_s22  ;;  %s186_s30 = int_to_ptr.vmem [resolvable:$true] %s185_s30 }
  0x1b   : > { %s173_s5 = scalar_lea.sflag [#allocation5], %s172_s9  ;;  %s3021_s7 = sshra.s32 %s184_s22, 4  ;;  %s3022_s7 = int_to_ptr.hbm [resolvable:$true] %s3021_s7 }
  0x1c   : > { %s3023_s25 = scalar_lea.hbm %s3022_s7, 64  ;;  %p3025_p8 = pneg %p3217_p7 }
  0x1d   : > { %p3024_p5 = scmp.ne.s32.totalorder %s3022_s7, %s3023_s25  ;;  %s3028_s1 = scalar_lea.hbm %s4296_s0, 128 }
  0x1e   : > { %p3029_p1 = scmp.lt.s32.totalorder %s3022_s7, %s4296_s0  ;;  %p3030_p2 = scmp.lt.s32.totalorder %s3028_s1, %s3023_s25 }
  0x1f   : > { %p3026_p9 = pnand %p3025_p8, %p3024_p5 }
  0x20   : > { %p3031_p3 = por %p3030_p2, %p3029_p1 }
  0x21   : > { %p3027_p10 = pneg %p3026_p9 }
  0x23   : > { %p3032_p0 = pnand %p3031_p3, %p3027_p10 }
  0x25   : > { %3035 = shalt.err (!%p3032_p0)
}
  0x26   : > { %s3096_s9 = smov 256   ;;  %s3097_s11 = smov 16  }
  0x27   : > { %2926 = dma.hbm_to_vmem [thread:$0]  (!%p3217_p7), %s184_s22, 1024, %s186_s30, %s173_s5, %s3096_s9, %s3096_s9, %s3097_s11  }
  0x28   : > { %197 = sbr.rel (%p3201_p13) target bundleno = 995 (0x3e3), region = 36  ;;  %s3238_s14 = sand.u32 (!%p3201_p13), 1, %s3085_s16  }
  0x29   : > { %s2484_s20 = sshll.u32 (!%p3201_p13), %s3238_s14, 6  ;;  %s200_s23 = scalar_lea.sflag (!%p3201_p13), [#allocation5], %s3238_s14 }
  0x2a   : > { %s3242_s1 = scalar_lea.vmem (!%p3201_p13), [#allocation4], %s2484_s20 }
  0x2d   : > { %3068 = dma.done.wait (%p3186_p6), %s200_s23, 1024  }
  0x2e   : > { %3070 = vsyncadd (%p3186_p6), %s200_s23, 4294966272 }
  0x2f   : > { %3072 = dma.done.wait (%p42_p4), [#allocation8], 64  }
  0x30   : > { %3074 = vsyncadd (%p42_p4), [#allocation8], 4294967232  ;;  %v264_v0 = vld [vmem:[#allocation7 + $0x1] ss:$2 sm:$0x3]  ;;  %v3256_v5 = vld [vmem:[%s3242_s1 + $0x8] sm:$0xff] }
  0x31   : > { %v262_v1 = vld [vmem:[#allocation7] ss:$2 sm:$0x3]  ;;  %v435_v2 = vperm.slane %v264_v0, 0  ;;  %s3098_s26 = smov 1   ;;  %s3099_s29 = smov 15   ;;  %v366_v19 = vpack.c.bf16 %v3256_v5, %v3256_v5 }
  0x32   : > { %v272_v3 = vperm.slane %v262_v1, 0  ;;  %v3253_v4 = vld [vmem:[%s3242_s1] sm:$0xff]  ;;  %s3100_s10 = smov 17   ;;  %v436_v7 = vperm.slane %v264_v0, 1  ;;  %v273_v8 = vperm.slane %v262_v1, 1  ;;  %v3269_v10 = vld [vmem:[%s3242_s1 + $0x28] sm:$0xff] }
  0x33   : > { %v615_v6 = vpack.c.bf16 %v3256_v5, %v3253_v4  ;;  %633 = vrot.lane.b32.xlu1 %v435_v2, %s3098_s26  ;;  %882 = vrot.lane.b32.xlu2 %v435_v2, %s3100_s10  ;;  %v3266_v9 = vld [vmem:[%s3242_s1 + $0x20] sm:$0xff]  ;;  %v3275_v12 = vld [vmem:[%s3242_s1 + $0x10] sm:$0xff]  ;;  %s3101_s22 = smov 127   ;;  %s3102_s30 = smov 113   ;;  %v3105_v18 = vmov 0.0|0.0   ;;  %v3106_v20 = vmov 0.0  }
  0x34   : > { %723 = vrot.lane.b32.xlu0 %v272_v3, %s3099_s29  ;;  %v623_v11 = vpack.c.bf16 %v3269_v10, %v3266_v9  ;;  %v3278_v13 = vld [vmem:[%s3242_s1 + $0x18] sm:$0xff]  ;;  %v3285_v15 = vld [vmem:[%s3242_s1 + $0x30] sm:$0xff]  ;;  %s3103_s5 = smov 111   ;;  %s3104_s7 = smov 112   ;;  %v365_v21 = vpack.c.bf16 %v3253_v4, %v3106_v20  ;;  %v367_v22 = vpack.c.bf16 %v3275_v12, %v3106_v20  ;;  %vm473_vm0 = vcmask 121856  }
  0x35   : > { %617 = vst [vmem:[#allocation3 + $0x80] sm:$0xff] %v615_v6  ;;  %v616_v14 = vpack.c.bf16 %v3278_v13, %v3275_v12  ;;  %v3288_v16 = vld [vmem:[%s3242_s1 + $0x38] sm:$0xff]  ;;  %s3107_s25 = smov 16   ;;  %vm563_vm1 = vcmask 7168   ;;  %vm311_vm2 = vcmask 138240   ;;  %vm531_vm3 = vcmask 1039360  }
  0x36   : > { %625 = vst [vmem:[#allocation3 + $0x88] sm:$0xff] %v623_v11  ;;  %v624_v17 = vpack.c.bf16 %v3288_v16, %v3285_v15  ;;  %vm309_vm4 = vcmask 1043456   ;;  %vm834_vm5 = vcmask 916480   ;;  %vm441_vm6 = vcmask 924672   ;;  %s2486_s12 = sshll.u32 %s3238_s14, 7  ;;  %s2353_s6 = scalar_lea.sflag [#allocation6], %s3238_s14 }
  0x37   : > { %618 = vst [vmem:[#allocation3 + $0x90] sm:$0xff] %v616_v14  ;;  %vm386_vm7 = vcmask 130048   ;;  %vm278_vm8 = vcmask 908288   ;;  %s3727_s9 = scalar_lea.vmem [#allocation9], %s2486_s12 }
  0x38   : > { %626 = vst [vmem:[#allocation3 + $0x98] sm:$0xff] %v624_v17 }
  0x3b   : > { %635 = vrot.lane.b32.xlu1 %v436_v7, %s3098_s26  ;;  %884 = vrot.lane.b32.xlu2 %v436_v7, %s3100_s10 }
  0x3c   : > { %725 = vrot.lane.b32.xlu0 %v273_v8, %s3099_s29 }
  0x43   : > { %529 = vrot.lane.b32.xlu1 %v273_v8, %s3101_s22  ;;  %437 = vrot.lane.b32.xlu2 %v435_v2, %s3102_s30 }
  0x44   : > { %527 = vrot.lane.b32.xlu0 %v272_v3, %s3101_s22 }
  0x4b   : > { %274 = vrot.lane.b32.xlu1 %v272_v3, %s3103_s5  ;;  %276 = vrot.lane.b32.xlu2 %v273_v8, %s3103_s5 }
  0x4c   : > { %439 = vrot.lane.b32.xlu0 %v436_v7, %s3102_s30 }
  0x53   : > { %823 = vrot.lane.b32.xlu1 %v3105_v18, %s3104_s7  ;;  %825 = vrot.lane.b32.xlu2 %v616_v14, %s3104_s7 }
  0x54   : > { %821 = vrot.lane.b32.xlu0 %v615_v6, %s3104_s7 }
  0x5b   : > { %856 = vrot.lane.b32.xlu1 %v623_v11, %s3104_s7  ;;  %858 = vrot.lane.b32.xlu2 %v3105_v18, %s3104_s7 }
  0x5c   : > { %827 = vrot.lane.b32.xlu0 %v3105_v18, %s3104_s7 }
  0x63   : > { %862 = vrot.lane.b32.xlu1 %v3105_v18, %s3104_s7  ;;  %377 = vrot.lane.b32.xlu2 %v367_v22, %s3107_s25 }
  0x64   : > { %860 = vrot.lane.b32.xlu0 %v624_v17, %s3104_s7 }
  0x6b   : > { %375 = vrot.lane.b32.xlu1 %v366_v19, %s3107_s25 }
  0x6c   : > { %373 = vrot.lane.b32.xlu0 %v365_v21, %s3107_s25 }
  0x8d   : > { %v3321_v25 = vpop.permute.xlu2 %882 }
  0x8e   : > { %v894_v6 = vmul.f32 %v3321_v25, %v3275_v12  ;;  %v891_v22 = vmul.f32 %v3321_v25, %v3253_v4 }
  0x95   : > { %v885_v32 = vpop.permute.xlu2 %884 }
  0x96   : > { %v893_v33 = vmul.f32 0.0, %v885_v32  ;;  %v3398_v62 = vsel %vm311_vm2, %v3321_v25, %v885_v32 }
  0x97   : > { %v895_v7 = vmul.f32 %v3398_v62, %v3278_v13 }
  0x98   : > { %v3333_v35 = vpack.c.bf16 %v893_v33, %v893_v33 }
  0x9d   : > { %v3357_v44 = vpop.permute.xlu2 %437 }
  0xa5   : > { %v3317_v23 = vpop.permute.xlu1 %633  ;;  %v3371_v50 = vpop.permute.xlu2 %276 }
  0xa6   : > { %v3319_v24 = vpop.permute.xlu0 %723  ;;  %v645_v59 = vmul.f32 %v3317_v23, %v3275_v12  ;;  %v642_v60 = vmul.f32 %v3317_v23, %v3253_v4 }
  0xa7   : > { %v732_v48 = vmul.f32 %v3319_v24, %v3253_v4  ;;  %v735_v57 = vmul.f32 %v3319_v24, %v3275_v12 }
  0xad   : > { %v636_v26 = vpop.permute.xlu1 %635  ;;  %v826_v61 = vpop.permute.xlu2 %825 }
  0xae   : > { %v726_v27 = vpop.permute.xlu0 %725  ;;  %v644_v28 = vmul.f32 0.0, %v636_v26  ;;  %v3375_v52 = vsel %vm563_vm1, %v3317_v23, %v636_v26  ;;  %v831_v8 = vrot.slane %v826_v61, 4  ;;  %v892_v26 = vmul.f32 %v3398_v62, %v3256_v5 }
  0xaf   : > { %v734_v29 = vmul.f32 0.0, %v726_v27  ;;  %v3361_v47 = vsel %vm473_vm0, %v3319_v24, %v726_v27  ;;  %v646_v54 = vmul.f32 %v3375_v52, %v3278_v13  ;;  %v643_v55 = vmul.f32 %v3375_v52, %v3256_v5 }
  0xb0   : > { %v3323_v30 = vpack.c.bf16 %v644_v28, %v644_v28  ;;  %v733_v49 = vmul.f32 %v3361_v47, %v3256_v5  ;;  %v736_v58 = vmul.f32 %v3361_v47, %v3278_v13 }
  0xb1   : > { %v3325_v31 = vpack.c.bf16 %v734_v29, %v734_v29  ;;  %v650_v63 = vpack.c.bf16 %v646_v54, %v645_v59  ;;  %v648_v0 = vpack.c.bf16 %v643_v55, %v642_v60  ;;  %v774_v54 = vmul.f32 %v3269_v10, %v3361_v47 }
  0xb2   : > { %658 = vrot.lane.b32.xlu0 %v3323_v30, %s3101_s22  ;;  %v738_v51 = vpack.c.bf16 %v733_v49, %v732_v48  ;;  %v740_v2 = vpack.c.bf16 %v736_v58, %v735_v57  ;;  %v776_v59 = vmul.f32 %v3285_v15, %v3319_v24  ;;  %v777_v60 = vmul.f32 %v3288_v16, %v3361_v47 }
  0xb3   : > { %748 = vrot.lane.b32.xlu2 %v3325_v31, %s3102_s30  ;;  %752 = vrot.lane.b32.xlu1 %v3325_v31, %s3102_s30 }
  0xb5   : > { %v3335_v36 = vpop.permute.xlu1 %529 }
  0xb6   : > { %v528_v34 = vpop.permute.xlu0 %527  ;;  %v541_v37 = vmul.f32 %v3335_v36, %v3278_v13  ;;  %v538_v38 = vmul.f32 %v3335_v36, %v3256_v5 }
  0xb7   : > { %v3402_v1 = vsel %vm531_vm3, %v528_v34, %v3335_v36  ;;  %v3411_v14 = vmul.f32 0.0, %v528_v34  ;;  %v899_v34 = vpack.c.bf16 %v895_v7, %v894_v6  ;;  %v686_v7 = vmul.f32 %v3285_v15, %v3317_v23 }
  0xb8   : > { %v545_v39 = vpack.c.bf16 %v541_v37, %v541_v37  ;;  %v543_v40 = vpack.c.bf16 %v538_v38, %v538_v38  ;;  %v540_v17 = vmul.f32 %v3402_v1, %v3275_v12 }
  0xba   : > { %911 = vrot.lane.b32.xlu0 %v3333_v35, %s3103_s5  ;;  %v544_v33 = vpack.c.bf16 %v540_v17, %v3411_v14 }
  0xbb   : > { %662 = vrot.lane.b32.xlu2 %v3323_v30, %s3101_s22  ;;  %907 = vrot.lane.b32.xlu1 %v3333_v35, %s3103_s5 }
  0xbd   : > { %v3382_v53 = vpop.permute.xlu1 %274 }
  0xbe   : > { %v3347_v41 = vpop.permute.xlu0 %439 }
  0xbf   : > { %v448_v42 = vmul.f32 %v3347_v41, %v3256_v5  ;;  %v451_v43 = vmul.f32 %v3347_v41, %v3278_v13  ;;  %v3427_v38 = vsel %vm441_vm6, %v3357_v44, %v3347_v41 }
  0xc0   : > { %v447_v48 = vmul.f32 %v3427_v38, %v3253_v4 }
  0xc1   : > { %v453_v45 = vpack.c.bf16 %v448_v42, %v448_v42  ;;  %v455_v46 = vpack.c.bf16 %v451_v43, %v451_v43 }
  0xc2   : > { %552 = vrot.lane.b32.xlu0 %v543_v40, %s3098_s26  ;;  %v859_v40 = vpop.permute.xlu2 %858 }
  0xc3   : > { %556 = vrot.lane.b32.xlu2 %v545_v39, %s3098_s26  ;;  %789 = vrot.lane.b32.xlu1 %v3325_v31, %s3102_s30  ;;  %v897_v39 = vpack.c.bf16 %v892_v26, %v891_v22  ;;  %v865_v42 = vrot.slane %v859_v40, 4 }
  0xc5   : > { %v824_v11 = vpop.permute.xlu1 %823 }
  0xc6   : > { %v822_v56 = vpop.permute.xlu0 %821  ;;  %v830_v19 = vrot.slane %v824_v11, 4 }
  0xc7   : > { %v829_v3 = vrot.slane %v822_v56, 4 }
  0xc9   : > { %v833_v28 = vsel %vm309_vm4, %v829_v3, %v830_v19  ;;  %v781_v19 = vpack.c.bf16 %v777_v60, %v776_v59  ;;  %v3491_v59 = vmul.f32 0.0, %v3382_v53 }
  0xca   : > { %793 = vrot.lane.b32.xlu0 %v3325_v31, %s3102_s30  ;;  %v835_v29 = vsel %vm834_vm5, %v822_v56, %v833_v28  ;;  %v684_v28 = vmul.f32 %v3269_v10, %v3375_v52  ;;  %v3497_v60 = vpop.permute.xlu2 %377 }
  0xcb   : > { %462 = vrot.lane.b32.xlu2 %v453_v45, %s3099_s29  ;;  %466 = vrot.lane.b32.xlu1 %v455_v46, %s3099_s29  ;;  %840 = vst [vmem:[#allocation3 + $0xe0] sm:$0xff] %v835_v29  ;;  %v3433_v45 = vmul.f32 0.0, %v3357_v44  ;;  %v537_v46 = vmul.f32 %v3402_v1, %v3253_v4  ;;  %v932_v29 = vmul.f32 %v3266_v9, %v3321_v25 }
  0xcd   : > { %v857_v43 = vpop.permute.xlu1 %856  ;;  %v542_v44 = vpack.c.bf16 %v537_v46, %v3411_v14  ;;  %v452_v57 = vpack.c.bf16 %v447_v48, %v3433_v45 }
  0xce   : > { %v828_v21 = vpop.permute.xlu0 %827  ;;  %v864_v49 = vrot.slane %v857_v43, 4 }
  0xcf   : > { %v832_v27 = vrot.slane %v828_v21, 4 }
  0xd0   : > { %v868_v55 = vsel %vm309_vm4, %v864_v49, %v865_v42  ;;  %v935_v49 = vmul.f32 %v3285_v15, %v3321_v25 }
  0xd1   : > { %v836_v32 = vsel %vm309_vm4, %v831_v8, %v832_v27  ;;  %v869_v56 = vsel %vm834_vm5, %v857_v43, %v868_v55 }
  0xd2   : > { %699 = vrot.lane.b32.xlu0 %v3323_v30, %s3101_s22  ;;  %v837_v37 = vsel %vm834_vm5, %v826_v61, %v836_v32  ;;  %874 = vst [vmem:[#allocation3 + $0xe8] sm:$0xff] %v869_v56  ;;  %v687_v61 = vmul.f32 %v3288_v16, %v3375_v52  ;;  %v933_v32 = vmul.f32 %v3269_v10, %v3398_v62 }
  0xd3   : > { %703 = vrot.lane.b32.xlu2 %v3323_v30, %s3101_s22  ;;  %746 = vrot.lane.b32.xlu1 %v738_v51, %s3102_s30  ;;  %841 = vst [vmem:[#allocation3 + $0xf0] sm:$0xff] %v837_v37  ;;  %v773_v51 = vmul.f32 %v3266_v9, %v3319_v24 }
  0xd4   : > { %v691_v21 = vpack.c.bf16 %v687_v61, %v686_v7 }
  0xd5   : > { %v779_v58 = vpack.c.bf16 %v774_v54, %v773_v51  ;;  %v863_v3 = vpop.permute.xlu1 %862  ;;  %v936_v51 = vmul.f32 %v3288_v16, %v3398_v62 }
  0xd6   : > { %v861_v6 = vpop.permute.xlu0 %860  ;;  %v867_v11 = vrot.slane %v863_v3, 4 }
  0xd7   : > { %v866_v17 = vrot.slane %v861_v6, 4 }
  0xd9   : > { %v870_v22 = vsel %vm309_vm4, %v866_v17, %v867_v11  ;;  %v2621_v55 = vld [vmem:[#allocation3 + $0xe8] sm:$0xf] }
  0xda   : > { %750 = vrot.lane.b32.xlu0 %v740_v2, %s3102_s30  ;;  %v2859_v2 = vld [vmem:[#allocation3 + $0xec] sm:$0xf0]  ;;  %v871_v27 = vsel %vm834_vm5, %v861_v6, %v870_v22  ;;  %v288_v6 = vmul.f32 %v3371_v50, %v3278_v13 }
  0xdb   : > { %660 = vrot.lane.b32.xlu1 %v650_v63, %s3101_s22  ;;  %656 = vrot.lane.b32.xlu2 %v648_v0, %s3101_s22  ;;  %v450_v63 = vmul.f32 %v3427_v38, %v3275_v12  ;;  %v2613_v0 = vld [vmem:[#allocation3 + $0xe0] sm:$0xf]  ;;  %875 = vst [vmem:[#allocation3 + $0xf8] sm:$0xff] %v871_v27 }
  0xdc   : > { %v2614_v8 = vor.u32 %v2859_v2, %v2613_v0 }
  0xdd   : > { %v454_v26 = vpack.c.bf16 %v450_v63, %v3433_v45  ;;  %v376_v40 = vpop.permute.xlu1 %375 }
  0xde   : > { %1209 = vmatpush.bf16.msra.mxu0 %v2614_v8  ;;  %v374_v42 = vpop.permute.xlu0 %373  ;;  %v382_v43 = vrot.slane %v376_v40, 4  ;;  %v292_v8 = vpack.c.bf16 %v288_v6, %v288_v6  ;;  %v330_v6 = vmul.f32 %v3288_v16, %v3371_v50 }
  0xdf   : > { %v381_v46 = vrot.slane %v374_v42, 4 }
  0xe1   : > { %v385_v48 = vsel %vm309_vm4, %v381_v46, %v382_v43 }
  0xe2   : > { %905 = vrot.lane.b32.xlu0 %v897_v39, %s3103_s5  ;;  %v938_v39 = vpack.c.bf16 %v933_v32, %v932_v29  ;;  %v387_v54 = vsel %vm386_vm7, %v374_v42, %v385_v48  ;;  %v2860_v56 = vld [vmem:[#allocation3 + $0xf4] sm:$0xf0]  ;;  %v492_v32 = vmul.f32 %v3288_v16, %v3347_v41  ;;  %v402_v48 = vpack.c.bf16 %v3285_v15, %v3106_v20 }
  0xe3   : > { %554 = vrot.lane.b32.xlu1 %v544_v33, %s3098_s26  ;;  %909 = vrot.lane.b32.xlu2 %v899_v34, %s3103_s5  ;;  %v683_v33 = vmul.f32 %v3266_v9, %v3317_v23  ;;  %v368_v34 = vpack.c.bf16 %v3278_v13, %v3278_v13  ;;  %392 = vst [vmem:[#allocation3 + $0x20] sm:$0xff] %v387_v54 }
  0xe4   : > { %v581_v13 = vmul.f32 %v3285_v15, %v3402_v1 }
  0xe5   : > { %v689_v37 = vpack.c.bf16 %v684_v28, %v683_v33  ;;  %v3108_v28 = vmov 0   ;;  %v489_v33 = vmul.f32 %v3269_v10, %v3347_v41 }
  0xe6   : > { %2988 = vset.pattern.permute.xlu1 %v3108_v28  ;;  %2989 = vset.pattern.permute.xlu2 %v3108_v28 }
  0xe7   : > { %2990 = vset.pattern.permute.xlu0 %v3108_v28 }
  0xea   : > { %787 = vrot.lane.b32.xlu0 %v779_v58, %s3102_s30  ;;  %v940_v58 = vpack.c.bf16 %v936_v51, %v935_v49  ;;  %v400_v49 = vpack.c.bf16 %v3266_v9, %v3106_v20  ;;  %v401_v51 = vpack.c.bf16 %v3269_v10, %v3269_v10 }
  0xeb   : > { %550 = vrot.lane.b32.xlu2 %v542_v44, %s3098_s26  ;;  %460 = vrot.lane.b32.xlu1 %v452_v57, %s3099_s29  ;;  %v2622_v44 = vor.u32 %v2860_v56, %v2621_v55  ;;  %v3488_v57 = vsel %vm278_vm8, %v3382_v53, %v3371_v50  ;;  %v285_v53 = vmul.f32 %v3371_v50, %v3256_v5 }
  0xec   : > { %v287_v61 = vmul.f32 %v3488_v57, %v3275_v12  ;;  %v284_v63 = vmul.f32 %v3488_v57, %v3253_v4  ;;  %v579_v4 = vmul.f32 %v3269_v10, %v3335_v36  ;;  %v578_v5 = vmul.f32 %v3266_v9, %v3402_v1 }
  0xed   : > { %1265 = vmatpush.bf16.msra.mxu1 %v2622_v44  ;;  %v290_v3 = vpack.c.bf16 %v285_v53, %v285_v53  ;;  %v327_v56 = vmul.f32 %v3269_v10, %v3371_v50  ;;  %v329_v10 = vmul.f32 %v3285_v15, %v3488_v57 }
  0xee   : > { %v291_v0 = vpack.c.bf16 %v287_v61, %v3491_v59  ;;  %v289_v2 = vpack.c.bf16 %v284_v63, %v3491_v59  ;;  %v584_v7 = vpack.c.bf16 %v579_v4, %v579_v4  ;;  %v583_v11 = vpack.c.bf16 %v578_v5, %v3411_v14 }
  0xef   : > { %v403_v61 = vpack.c.bf16 %v3288_v16, %v3288_v16  ;;  %v332_v63 = vpack.c.bf16 %v327_v56, %v327_v56 }
  0xf2   : > { %464 = vrot.lane.b32.xlu0 %v454_v26, %s3099_s29  ;;  %v585_v26 = vpack.c.bf16 %v581_v13, %v3411_v14 }
  0xf3   : > { %791 = vrot.lane.b32.xlu2 %v781_v19, %s3102_s30  ;;  %701 = vrot.lane.b32.xlu1 %v691_v21, %s3101_s22  ;;  %v488_v19 = vmul.f32 %v3266_v9, %v3427_v38  ;;  %v582_v21 = vmul.f32 %v3288_v16, %v3335_v36 }
  0xf5   : > { %v493_v22 = vpack.c.bf16 %v488_v19, %v3433_v45  ;;  %v586_v27 = vpack.c.bf16 %v582_v21, %v582_v21  ;;  %v334_v19 = vpack.c.bf16 %v330_v6, %v330_v6 }
  0xfa   : > { %379 = vrot.lane.b32.xlu0 %v368_v34, %s3107_s25  ;;  %v491_v34 = vmul.f32 %v3285_v15, %v3427_v38 }
  0xfb   : > { %697 = vrot.lane.b32.xlu2 %v689_v37, %s3101_s22  ;;  %946 = vrot.lane.b32.xlu1 %v938_v39, %s3103_s5  ;;  %v496_v37 = vpack.c.bf16 %v492_v32, %v492_v32  ;;  %v494_v39 = vpack.c.bf16 %v489_v33, %v489_v33 }
  0xfc   : > { %v495_v40 = vpack.c.bf16 %v491_v34, %v3433_v45 }
 0x102   : > { %950 = vrot.lane.b32.xlu0 %v940_v58, %s3103_s5  ;;  %v326_v58 = vmul.f32 %v3266_v9, %v3488_v57 }
 0x103   : > { %948 = vrot.lane.b32.xlu2 %v3333_v35, %s3103_s5  ;;  %952 = vrot.lane.b32.xlu1 %v3333_v35, %s3103_s5 }
 0x104   : > { %v331_v53 = vpack.c.bf16 %v326_v58, %v3491_v59 }
 0x10a   : > { %299 = vrot.lane.b32.xlu0 %v290_v3, %s3100_s10 }
 0x10b   : > { %301 = vrot.lane.b32.xlu1 %v291_v0, %s3100_s10  ;;  %297 = vrot.lane.b32.xlu2 %v289_v2, %s3100_s10 }
 0x10d   : > { %v3511_v12 = vpop.permute.xlu2 %748 }
 0x10e   : > { %v755_v34 = vrot.slane %v3511_v12, 4 }
 0x112   : > { %591 = vrot.lane.b32.xlu0 %v583_v11, %s3098_s26  ;;  %v333_v11 = vpack.c.bf16 %v329_v10, %v3491_v59 }
 0x113   : > { %593 = vrot.lane.b32.xlu1 %v584_v7, %s3098_s26  ;;  %303 = vrot.lane.b32.xlu2 %v292_v8, %s3100_s10  ;;  %v1004_v7 = vld [vmem:[%s4299_s3] sm:$0xff] }
 0x115   : > { %v3523_v17 = vpop.permute.xlu2 %662 }
 0x116   : > { %v667_v58 = vrot.slane %v3523_v17, 4 }
 0x11a   : > { %597 = vrot.lane.b32.xlu0 %v586_v27, %s3098_s26  ;;  %v1005_v27 = vld [vmem:[%s4299_s3 + $0x8] sm:$0xff] }
 0x11b   : > { %501 = vrot.lane.b32.xlu1 %v493_v22, %s3099_s29  ;;  %595 = vrot.lane.b32.xlu2 %v585_v26, %s3098_s26 }
 0x11d   : > { %v3536_v29 = vpop.permute.xlu2 %556 }
 0x122   : > { %505 = vrot.lane.b32.xlu0 %v495_v40, %s3099_s29 }
 0x123   : > { %507 = vrot.lane.b32.xlu1 %v496_v37, %s3099_s29  ;;  %503 = vrot.lane.b32.xlu2 %v494_v39, %s3099_s29 }
 0x124   : > { %v659_v46 = vpop.permute.xlu0 %658 }
 0x125   : > { %v3548_v42 = vpop.permute.xlu2 %462  ;;  %v3550_v43 = vpop.permute.xlu1 %752  ;;  %v665_v3 = vrot.slane %v659_v46, 4 }
 0x126   : > { %v757_v10 = vrot.slane %v3550_v43, 4 }
 0x12a   : > { %410 = vrot.lane.b32.xlu0 %v401_v51, %s3107_s25 }
 0x12b   : > { %412 = vrot.lane.b32.xlu1 %v402_v48, %s3107_s25  ;;  %408 = vrot.lane.b32.xlu2 %v400_v49, %s3107_s25 }
 0x12c   : > { %v912_v44 = vpop.permute.xlu0 %911 }
 0x12d   : > { %v3561_v54 = vpop.permute.xlu2 %703  ;;  %v3563_v55 = vpop.permute.xlu1 %907  ;;  %v916_v13 = vrot.slane %v912_v44, 4 }
 0x132   : > { %339 = vrot.lane.b32.xlu0 %v331_v53, %s3100_s10 }
 0x133   : > { %341 = vrot.lane.b32.xlu1 %v332_v63, %s3100_s10  ;;  %414 = vrot.lane.b32.xlu2 %v403_v61, %s3107_s25 }
 0x134   : > { %v553_v4 = vpop.permute.xlu0 %552 }
 0x135   : > { %v3575_v0 = vpop.permute.xlu1 %789  ;;  %v657_v2 = vpop.permute.xlu2 %656  ;;  %v559_v37 = vrot.slane %v553_v4, 4 }
 0x136   : > { %v664_v9 = vrot.slane %v657_v2, 4 }
 0x138   : > { %v668_v5 = vsel %vm309_vm4, %v664_v9, %v665_v3 }
 0x139   : > { %v670_v8 = vsel %vm531_vm3, %v657_v2, %v668_v5 }
 0x13a   : > { %675 = vst [vmem:[#allocation3 + $0xa0] sm:$0xff] %v670_v8  ;;  %345 = vrot.lane.b32.xlu0 %v334_v19, %s3100_s10 }
 0x13b   : > { %1008 = vperm.xlu1 %2988, %v1004_v7   ;;  %343 = vrot.lane.b32.xlu2 %v333_v11, %s3100_s10  ;;  %v561_v11 = vrot.slane %v3536_v29, 4 }
 0x13c   : > { %v794_v22 = vpop.permute.xlu0 %793 }
 0x13d   : > { %v3589_v15 = vpop.permute.xlu1 %466  ;;  %v910_v16 = vpop.permute.xlu2 %909  ;;  %v798_v61 = vrot.slane %v794_v22, 4  ;;  %v914_v22 = vrot.slane %v3563_v55, 4 }
 0x13e   : > { %v915_v21 = vrot.slane %v910_v16, 4 }
 0x140   : > { %v920_v26 = vsel %vm309_vm4, %v915_v21, %v916_v13 }
 0x141   : > { %v921_v28 = vsel %vm278_vm8, %v910_v16, %v920_v26 }
 0x142   : > { %925 = vst [vmem:[#allocation3 + $0x110] sm:$0xff] %v921_v28  ;;  %1850 = vrot.lane.b32.xlu0 %v3105_v18, %s3104_s7 }
 0x143   : > { %1846 = vrot.lane.b32.xlu1 %v3105_v18, %s3104_s7  ;;  %1013 = vperm.xlu2 %2989, %v1005_v27  }
 0x144   : > { %v700_v46 = vpop.permute.xlu0 %699 }
 0x145   : > { %v747_v32 = vpop.permute.xlu1 %746  ;;  %v551_v33 = vpop.permute.xlu2 %550  ;;  %v706_v19 = vrot.slane %v700_v46, 4  ;;  %v469_v46 = vrot.slane %v3548_v42, 4 }
 0x146   : > { %v754_v39 = vrot.slane %v747_v32, 4  ;;  %v558_v40 = vrot.slane %v551_v33, 4 }
 0x148   : > { %v758_v48 = vsel %vm309_vm4, %v754_v39, %v755_v34  ;;  %v562_v49 = vsel %vm309_vm4, %v558_v40, %v559_v37 }
 0x149   : > { %v760_v51 = vsel %vm441_vm6, %v747_v32, %v758_v48  ;;  %v564_v56 = vsel %vm563_vm1, %v551_v33, %v562_v49  ;;  %v2863_v42 = vld [vmem:[#allocation3 + $0x10c] sm:$0xf0] }
 0x14a   : > { %765 = vst [vmem:[#allocation3 + $0xc0] sm:$0xff] %v760_v51  ;;  %1692 = vrot.lane.b32.xlu0 %v3323_v30, %s3101_s22  ;;  %v2581_v51 = vld [vmem:[#allocation3 + $0xa0] sm:$0xf] }
 0x14b   : > { %569 = vst [vmem:[#allocation3 + $0x60] sm:$0xff] %v564_v56  ;;  %1776 = vrot.lane.b32.xlu1 %v3325_v31, %s3102_s30  ;;  %1772 = vrot.lane.b32.xlu2 %v3325_v31, %s3102_s30  ;;  %v796_v56 = vrot.slane %v3575_v0, 4 }
 0x14c   : > { %v751_v2 = vpop.permute.xlu0 %750 }
 0x14d   : > { %v661_v12 = vpop.permute.xlu1 %660  ;;  %v792_v44 = vpop.permute.xlu2 %791  ;;  %v756_v3 = vrot.slane %v751_v2, 4 }
 0x14e   : > { %v666_v63 = vrot.slane %v661_v12, 4  ;;  %v797_v53 = vrot.slane %v792_v44, 4 }
 0x14f   : > { %v761_v7 = vsel %vm309_vm4, %v756_v3, %v757_v10 }
 0x150   : > { %v671_v9 = vsel %vm309_vm4, %v666_v63, %v667_v58  ;;  %v801_v4 = vsel %vm309_vm4, %v797_v53, %v798_v61  ;;  %v762_v17 = vsel %vm441_vm6, %v751_v2, %v761_v7  ;;  %v2565_v58 = vld [vmem:[#allocation3 + $0x80] sm:$0xf]  ;;  %v2847_v61 = vld [vmem:[#allocation3 + $0x8c] sm:$0xf0]  ;;  %v2857_v2 = vld [vmem:[#allocation3 + $0xe4] sm:$0xf] }
 0x151   : > { %v672_v6 = vsel %vm531_vm3, %v661_v12, %v671_v9  ;;  %v802_v5 = vsel %vm441_vm6, %v792_v44, %v801_v4  ;;  %766 = vst [vmem:[#allocation3 + $0xd0] sm:$0xff] %v762_v17  ;;  %v2597_v55 = vld [vmem:[#allocation3 + $0xc0] sm:$0xf]  ;;  %v2631_v9 = vld [vmem:[#allocation3 + $0x110] sm:$0xf0]  ;;  %v2566_v0 = vor.u32 %v2847_v61, %v2565_v58 }
 0x152   : > { %676 = vst [vmem:[#allocation3 + $0xb0] sm:$0xff] %v672_v6  ;;  %1884 = vrot.lane.b32.xlu0 %v3105_v18, %s3104_s7  ;;  %v2615_v4 = vld [vmem:[#allocation3 + $0xf0] sm:$0xf0]  ;;  %v2495_v7 = vld [vmem:[%s4298_s2 + $0x8] sm:$0xf0] }
 0x153   : > { %806 = vst [vmem:[#allocation3 + $0xd8] sm:$0xff] %v802_v5  ;;  %1880 = vrot.lane.b32.xlu1 %v3105_v18, %s3104_s7  ;;  %1696 = vrot.lane.b32.xlu2 %v3323_v30, %s3101_s22  ;;  %v2827_v5 = vld [vmem:[%s4298_s2 + $0x4] sm:$0xf] }
 0x154   : > { %v906_v21 = vpop.permute.xlu0 %905 }
 0x155   : > { %v555_v43 = vpop.permute.xlu1 %554  ;;  %v698_v8 = vpop.permute.xlu2 %697  ;;  %v913_v26 = vrot.slane %v906_v21, 4 }
 0x156   : > { %v560_v16 = vrot.slane %v555_v43, 4  ;;  %v705_v13 = vrot.slane %v698_v8, 4 }
 0x157   : > { %v917_v18 = vsel %vm309_vm4, %v913_v26, %v914_v22  ;;  %v708_v22 = vrot.slane %v3561_v54, 4 }
 0x158   : > { %v565_v27 = vsel %vm309_vm4, %v560_v16, %v561_v11  ;;  %v709_v28 = vsel %vm309_vm4, %v705_v13, %v706_v19  ;;  %v919_v29 = vsel %vm278_vm8, %v906_v21, %v917_v18  ;;  %v2855_v34 = vld [vmem:[#allocation3 + $0xcc] sm:$0xf0]  ;;  %v2618_v16 = vor.u32 %v2857_v2, %v2615_v4 }
 0x159   : > { %v566_v32 = vsel %vm563_vm1, %v555_v43, %v565_v27  ;;  %v710_v33 = vsel %vm531_vm3, %v698_v8, %v709_v28  ;;  %924 = vst [vmem:[#allocation3 + $0x100] sm:$0xff] %v919_v29  ;;  %v2598_v37 = vor.u32 %v2855_v34, %v2597_v55  ;;  %v2851_v40 = vld [vmem:[#allocation3 + $0xac] sm:$0xf0]  ;;  %v3657_v21 = vor.u32 %v2827_v5, %v2495_v7  ;;  %v2599_v28 = vld [vmem:[#allocation3 + $0xd0] sm:$0xf0] }
 0x15a   : > { %570 = vst [vmem:[#allocation3 + $0x70] sm:$0xff] %v566_v32  ;;  %1920 = vrot.lane.b32.xlu0 %v3333_v35, %s3103_s5  ;;  %v2582_v53 = vor.u32 %v2851_v40, %v2581_v51  ;;  %v471_v32 = vrot.slane %v3589_v15, 4  ;;  %v2853_v55 = vld [vmem:[#allocation3 + $0xc4] sm:$0xf]  ;;  %v2583_v40 = vld [vmem:[#allocation3 + $0xb0] sm:$0xf0] }
 0x15b   : > { %715 = vst [vmem:[#allocation3 + $0xa8] sm:$0xff] %v710_v33  ;;  %1812 = vrot.lane.b32.xlu1 %v3325_v31, %s3102_s30  ;;  %1924 = vrot.lane.b32.xlu2 %v3333_v35, %s3103_s5  ;;  %v2849_v51 = vld [vmem:[#allocation3 + $0xa4] sm:$0xf] }
 0x15c   : > { %1210 = vmatpush.bf16.msra.mxu0 %v2598_v37  ;;  %v788_v49 = vpop.permute.xlu0 %787  ;;  %v2586_v61 = vor.u32 %v2849_v51, %v2583_v40 }
 0x15d   : > { %v461_v39 = vpop.permute.xlu1 %460  ;;  %v3641_v12 = vpop.permute.xlu2 %948  ;;  %v795_v44 = vrot.slane %v788_v49, 4 }
 0x15e   : > { %v468_v48 = vrot.slane %v461_v39, 4 }
 0x15f   : > { %v799_v3 = vsel %vm309_vm4, %v795_v44, %v796_v56  ;;  %v2845_v56 = vld [vmem:[#allocation3 + $0x84] sm:$0xf]  ;;  %v2567_v44 = vld [vmem:[#allocation3 + $0x90] sm:$0xf0] }
 0x160   : > { %v472_v63 = vsel %vm309_vm4, %v468_v48, %v469_v46  ;;  %v800_v6 = vsel %vm441_vm6, %v788_v49, %v799_v3  ;;  %1211 = vmatpush.bf16.msra.mxu0 %v2582_v53  ;;  %v2629_v17 = vld [vmem:[#allocation3 + $0x100] sm:$0xf]  ;;  %v2861_v43 = vld [vmem:[#allocation3 + $0x104] sm:$0xf]  ;;  %v2856_v48 = vld [vmem:[#allocation3 + $0xd4] sm:$0xf0] }
 0x161   : > { %v474_v10 = vsel %vm473_vm0, %v461_v39, %v472_v63  ;;  %805 = vst [vmem:[#allocation3 + $0xc8] sm:$0xff] %v800_v6  ;;  %v2630_v8 = vor.u32 %v2863_v42, %v2629_v17  ;;  %v2634_v11 = vor.u32 %v2861_v43, %v2631_v9  ;;  %v2843_v13 = vld [vmem:[#allocation3 + $0x6c] sm:$0xf0]  ;;  %v2602_v39 = vor.u32 %v2853_v55, %v2599_v28  ;;  %v2551_v5 = vld [vmem:[#allocation3 + $0x70] sm:$0xf0] }
 0x162   : > { %479 = vst [vmem:[#allocation3 + $0x40] sm:$0xff] %v474_v10  ;;  %1816 = vrot.lane.b32.xlu0 %v3325_v31, %s3102_s30  ;;  %v2549_v31 = vld [vmem:[#allocation3 + $0x60] sm:$0xf]  ;;  %v955_v63 = vrot.slane %v3641_v12, 4  ;;  %v383_v10 = vrot.slane %v3497_v60, 4  ;;  %v2570_v42 = vor.u32 %v2845_v56, %v2567_v44 }
 0x163   : > { %1736 = vrot.lane.b32.xlu2 %v3323_v30, %s3101_s22  ;;  %1230 = vmatpush.bf16.msra.mxu2 %v2630_v8  ;;  %v2550_v29 = vor.u32 %v2843_v13, %v2549_v31  ;;  %v2589_v6 = vld [vmem:[#allocation3 + $0xa8] sm:$0xf]  ;;  %v2517_v31 = vld [vmem:[#allocation3 + $0x20] sm:$0xf] }
 0x164   : > { %1212 = vmatpush.bf16.msra.mxu0 %v2566_v0  ;;  %v465_v27 = vpop.permute.xlu0 %464  ;;  %1258 = vmatpush.bf16.msra.mxu3 %v2634_v11 }
 0x165   : > { %v702_v19 = vpop.permute.xlu1 %701  ;;  %v470_v33 = vrot.slane %v465_v27, 4  ;;  %v3664_v54 = vpop.permute.xlu2 %297 }
 0x166   : > { %v707_v26 = vrot.slane %v702_v19, 4  ;;  %2643 = vmatmul.msk.bf16.vlgmr.msra.gmra.mxu2 %vm386_vm7, %v3657_v21 }
 0x167   : > { %1237 = vmatpush.bf16.msrb.mxu2 %v2618_v16  ;;  %v475_v37 = vsel %vm309_vm4, %v470_v33, %v471_v32  ;;  %2644 = vmatmul.msk.bf16.vlgmr.msra.gmra.mxu3 %vm386_vm7, %v3657_v21 }
 0x168   : > { %v711_v18 = vsel %vm309_vm4, %v707_v26, %v708_v22  ;;  %v476_v15 = vsel %vm473_vm0, %v465_v27, %v475_v37  ;;  %1213 = vmatpush.bf16.msra.mxu0 %v2550_v29  ;;  %v2605_v46 = vld [vmem:[#allocation3 + $0xc8] sm:$0xf] }
 0x169   : > { %v712_v34 = vsel %vm531_vm3, %v702_v19, %v711_v18  ;;  %480 = vst [vmem:[#allocation3 + $0x50] sm:$0xff] %v476_v15  ;;  %v2606_v49 = vor.u32 %v2856_v48, %v2605_v46  ;;  %v2533_v7 = vld [vmem:[#allocation3 + $0x40] sm:$0xf]  ;;  %v2841_v19 = vld [vmem:[#allocation3 + $0x64] sm:$0xf] }
 0x16a   : > { %716 = vst [vmem:[#allocation3 + $0xb8] sm:$0xff] %v712_v34  ;;  %1732 = vrot.lane.b32.xlu0 %v3323_v30, %s3101_s22  ;;  %v2554_v13 = vor.u32 %v2841_v19, %v2551_v5  ;;  %v2837_v32 = vld [vmem:[#allocation3 + $0x44] sm:$0xf]  ;;  %v2573_v29 = vld [vmem:[#allocation3 + $0x88] sm:$0xf] }
 0x16b   : > { %1238 = vmatpush.bf16.msrb.mxu2 %v2602_v39  ;;  %1266 = vmatpush.bf16.msra.mxu1 %v2606_v49  ;;  %v2833_v18 = vld [vmem:[#allocation3 + $0x24] sm:$0xf]  ;;  %v2848_v39 = vld [vmem:[#allocation3 + $0x94] sm:$0xf0]  ;;  %v2854_v5 = vld [vmem:[#allocation3 + $0xcc] sm:$0xf] }
 0x16c   : > { %v380_v2 = vpop.permute.xlu0 %379  ;;  %v2574_v46 = vor.u32 %v2848_v39, %v2573_v29 }
 0x16d   : > { %v947_v58 = vpop.permute.xlu1 %946  ;;  %v384_v3 = vrot.slane %v380_v2, 4  ;;  %v304_v8 = vpop.permute.xlu2 %303 }
 0x16e   : > { %v954_v53 = vrot.slane %v947_v58, 4  ;;  %v308_v51 = vrot.slane %v304_v8, 4  ;;  %v2607_v8 = vld [vmem:[#allocation3 + $0xd8] sm:$0xf0] }
 0x16f   : > { %1239 = vmatpush.bf16.msrb.mxu2 %v2586_v61  ;;  %v388_v30 = vsel %vm309_vm4, %v383_v10, %v384_v3  ;;  %v2858_v10 = vld [vmem:[#allocation3 + $0xec] sm:$0xf]  ;;  %v2623_v3 = vld [vmem:[#allocation3 + $0xf8] sm:$0xf0] }
 0x170   : > { %v958_v9 = vsel %vm309_vm4, %v954_v53, %v955_v63  ;;  %v389_v12 = vsel %vm386_vm7, %v3497_v60, %v388_v30  ;;  %v2839_v17 = vld [vmem:[#allocation3 + $0x4c] sm:$0xf0]  ;;  %v2535_v27 = vld [vmem:[#allocation3 + $0x50] sm:$0xf0] }
 0x171   : > { %v959_v4 = vsel %vm278_vm8, %v947_v58, %v958_v9  ;;  %v2852_v0 = vld [vmem:[#allocation3 + $0xb4] sm:$0xf0]  ;;  %393 = vst [vmem:[#allocation3 + $0x30] sm:$0xff] %v389_v12  ;;  %v2534_v11 = vor.u32 %v2839_v17, %v2533_v7  ;;  %v2538_v33 = vor.u32 %v2837_v32, %v2535_v27  ;;  %v305_v58 = vrot.slane %v3664_v54, 4  ;;  %v2591_v19 = vld [vmem:[#allocation3 + $0xb8] sm:$0xf0] }
 0x172   : > { %964 = vst [vmem:[#allocation3 + $0x108] sm:$0xff] %v959_v4  ;;  %v2590_v43 = vor.u32 %v2852_v0, %v2589_v6  ;;  %v2626_v6 = vor.u32 %v2858_v10, %v2623_v3  ;;  %v2850_v27 = vld [vmem:[#allocation3 + $0xac] sm:$0xf] }
 0x173   : > { %1240 = vmatpush.bf16.msrb.mxu2 %v2570_v42  ;;  %1214 = vmatpush.bf16.msra.mxu0 %v2534_v11  ;;  %v2610_v11 = vor.u32 %v2854_v5, %v2607_v8 }
 0x174   : > { %1267 = vmatpush.bf16.msra.mxu1 %v2590_v43  ;;  %v951_v26 = vpop.permute.xlu0 %950 }
 0x175   : > { %v953_v16 = vpop.permute.xlu1 %952  ;;  %v956_v28 = vrot.slane %v951_v26, 4  ;;  %v3682_v48 = vpop.permute.xlu2 %595 }
 0x176   : > { %v957_v22 = vrot.slane %v953_v16, 4  ;;  %v2828_v16 = vld [vmem:[%s4298_s2 + $0x4] sm:$0xf0] }
 0x177   : > { %1241 = vmatpush.bf16.msrb.mxu2 %v2554_v13 }
 0x178   : > { %v960_v60 = vsel %vm309_vm4, %v956_v28, %v957_v22  ;;  %v2835_v34 = vld [vmem:[#allocation3 + $0x2c] sm:$0xf0]  ;;  %v2519_v37 = vld [vmem:[#allocation3 + $0x30] sm:$0xf0]  ;;  %1268 = vmatpush.bf16.msra.mxu1 %v2574_v46 }
 0x179   : > { %v961_v55 = vsel %vm278_vm8, %v951_v26, %v960_v60  ;;  %v2518_v40 = vor.u32 %v2835_v34, %v2517_v31  ;;  %v2522_v15 = vor.u32 %v2833_v18, %v2519_v37  ;;  %v2637_v9 = vld [vmem:[#allocation3 + $0x108] sm:$0xf]  ;;  %v2862_v31 = vld [vmem:[#allocation3 + $0x10c] sm:$0xf]  ;;  %v2575_v34 = vld [vmem:[#allocation3 + $0x98] sm:$0xf0]  ;;  %v2594_v37 = vor.u32 %v2850_v27, %v2591_v19 }
 0x17a   : > { %965 = vst [vmem:[#allocation3 + $0x118] sm:$0xff] %v961_v55  ;;  %v2846_v55 = vld [vmem:[#allocation3 + $0x8c] sm:$0xf] }
 0x17b   : > { %1242 = vmatpush.bf16.msrb.mxu2 %v2538_v33  ;;  %1215 = vmatpush.bf16.msra.mxu0 %v2518_v40 }
 0x17c   : > { %v300_v44 = vpop.permute.xlu0 %299 }
 0x17d   : > { %v302_v49 = vpop.permute.xlu1 %301  ;;  %v306_v61 = vrot.slane %v300_v44, 4  ;;  %v504_v17 = vpop.permute.xlu2 %503  ;;  %v601_v44 = vrot.slane %v3682_v48, 4 }
 0x17e   : > { %v307_v56 = vrot.slane %v302_v49, 4  ;;  %v510_v46 = vrot.slane %v504_v17, 4 }
 0x17f   : > { %1243 = vmatpush.bf16.msrb.mxu2 %v2522_v15  ;;  %v310_v2 = vsel %vm309_vm4, %v305_v58, %v306_v61 }
 0x180   : > { %v313_v63 = vsel %vm309_vm4, %v307_v56, %v308_v51  ;;  %v312_v42 = vsel %vm311_vm2, %v3664_v54, %v310_v2  ;;  %v2493_v54 = vld [vmem:[%s4298_s2] sm:$0xf]  ;;  %v2578_v56 = vor.u32 %v2846_v55, %v2575_v34 }
 0x181   : > { %v314_v53 = vsel %vm311_vm2, %v302_v49, %v313_v63  ;;  %v2864_v4 = vld [vmem:[#allocation3 + $0x114] sm:$0xf0]  ;;  %317 = vst [vmem:[#allocation3] sm:$0xff] %v312_v42  ;;  %v2639_v28 = vld [vmem:[#allocation3 + $0x118] sm:$0xf0]  ;;  %v3700_v40 = vor.u32 %v2828_v16, %v2493_v54 }
 0x182   : > { %318 = vst [vmem:[#allocation3 + $0x10] sm:$0xff] %v314_v53  ;;  %v2638_v30 = vor.u32 %v2864_v4, %v2637_v9  ;;  %v2642_v39 = vor.u32 %v2862_v31, %v2639_v28 }
 0x184   : > { %1286 = vmatpush.bf16.msrb.mxu3 %v2638_v30  ;;  %v592_v7 = vpop.permute.xlu0 %591 }
 0x185   : > { %v594_v0 = vpop.permute.xlu1 %593  ;;  %v599_v43 = vrot.slane %v592_v7, 4  ;;  %v409_v63 = vpop.permute.xlu2 %408 }
 0x186   : > { %v600_v12 = vrot.slane %v594_v0, 4 }
 0x187   : > { %2645 = vmatmul.msk.bf16.vlgmr.msrb.gmra.mxu3 %vm386_vm7, %v3657_v21 }
 0x188   : > { %1293 = vmatpush.bf16.msra.mxu3 %v2626_v6  ;;  %v603_v13 = vsel %vm309_vm4, %v599_v43, %v600_v12  ;;  %v2501_v60 = vld [vmem:[#allocation3] sm:$0xf]  ;;  %v2829_v33 = vld [vmem:[#allocation3 + $0x4] sm:$0xf] }
 0x189   : > { %v2831_v22 = vld [vmem:[#allocation3 + $0xc] sm:$0xf0]  ;;  %v2503_v26 = vld [vmem:[#allocation3 + $0x10] sm:$0xf0]  ;;  %v604_v32 = vsel %vm563_vm1, %v592_v7, %v603_v13 }
 0x18a   : > { %609 = vst [vmem:[#allocation3 + $0x68] sm:$0xff] %v604_v32  ;;  %v2502_v18 = vor.u32 %v2831_v22, %v2501_v60  ;;  %v2506_v29 = vor.u32 %v2829_v33, %v2503_v26 }
 0x18c   : > { %1294 = vmatpush.bf16.msra.mxu3 %v2610_v11  ;;  %1216 = vmatpush.bf16.msra.mxu0 %v2502_v18  ;;  %v598_v51 = vpop.permute.xlu0 %597 }
 0x18d   : > { %1244 = vmatpush.bf16.msrb.mxu2 %v2506_v29  ;;  %v502_v15 = vpop.permute.xlu1 %501  ;;  %v602_v58 = vrot.slane %v598_v51, 4  ;;  %v415_v17 = vpop.permute.xlu2 %414 }
 0x18e   : > { %v509_v49 = vrot.slane %v502_v15, 4  ;;  %v419_v11 = vrot.slane %v415_v17, 4 }
 0x18f   : > { %1217 = vmatmul.bf16.vlgmr.msra.gmra.mxu0 %v3700_v40  ;;  %v605_v2 = vsel %vm309_vm4, %v601_v44, %v602_v58 }
 0x190   : > { %1295 = vmatpush.bf16.msra.mxu3 %v2594_v37  ;;  %1314 = vmatpush.bf16.msrb.mxu0 %v2642_v39  ;;  %v513_v61 = vsel %vm309_vm4, %v509_v49, %v510_v46  ;;  %v606_v10 = vsel %vm563_vm1, %v3682_v48, %v605_v2  ;;  %v416_v48 = vrot.slane %v409_v63, 4 }
 0x191   : > { %1245 = vmatmul.bf16.vlgmr.msrb.gmra.mxu2 %v3700_v40  ;;  %v514_v53 = vsel %vm473_vm0, %v502_v15, %v513_v61  ;;  %610 = vst [vmem:[#allocation3 + $0x78] sm:$0xff] %v606_v10  ;;  %v2557_v6 = vld [vmem:[#allocation3 + $0x68] sm:$0xf]  ;;  %v2842_v12 = vld [vmem:[#allocation3 + $0x6c] sm:$0xf] }
 0x192   : > { %519 = vst [vmem:[#allocation3 + $0x48] sm:$0xff] %v514_v53 }
 0x194   : > { %1296 = vmatpush.bf16.msra.mxu3 %v2578_v56  ;;  %v506_v9 = vpop.permute.xlu0 %505 }
 0x195   : > { %v508_v3 = vpop.permute.xlu1 %507  ;;  %v511_v4 = vrot.slane %v506_v9, 4  ;;  %v344_v61 = vpop.permute.xlu2 %343 }
 0x196   : > { %v512_v42 = vrot.slane %v508_v3, 4  ;;  %v349_v53 = vrot.slane %v344_v61, 4 }
 0x198   : > { %v515_v30 = vsel %vm309_vm4, %v511_v4, %v512_v42  ;;  %v2844_v5 = vld [vmem:[#allocation3 + $0x74] sm:$0xf0]  ;;  %v2559_v7 = vld [vmem:[#allocation3 + $0x78] sm:$0xf0] }
 0x199   : > { %v516_v0 = vsel %vm473_vm0, %v506_v9, %v515_v30  ;;  %v2558_v43 = vor.u32 %v2844_v5, %v2557_v6  ;;  %v2562_v8 = vor.u32 %v2842_v12, %v2559_v7  ;;  %v2541_v28 = vld [vmem:[#allocation3 + $0x48] sm:$0xf]  ;;  %v2838_v32 = vld [vmem:[#allocation3 + $0x4c] sm:$0xf] }
 0x19a   : > { %520 = vst [vmem:[#allocation3 + $0x58] sm:$0xff] %v516_v0 }
 0x19b   : > { %1269 = vmatpush.bf16.msra.mxu1 %v2558_v43  ;;  %1297 = vmatpush.bf16.msra.mxu3 %v2562_v8 }
 0x19c   : > { %v411_v16 = vpop.permute.xlu0 %410 }
 0x19d   : > { %v413_v19 = vpop.permute.xlu1 %412  ;;  %v417_v13 = vrot.slane %v411_v16, 4 }
 0x19e   : > { %v418_v54 = vrot.slane %v413_v19, 4 }
 0x19f   : > { %2646 = vmatmul.msk.bf16.vlgmr.msrb.gmra.mxu0 %vm386_vm7, %v3657_v21  ;;  %v420_v27 = vsel %vm309_vm4, %v416_v48, %v417_v13 }
 0x1a0   : > { %v422_v22 = vsel %vm309_vm4, %v418_v54, %v419_v11  ;;  %v421_v60 = vsel %vm386_vm7, %v409_v63, %v420_v27 }
 0x1a1   : > { %v423_v26 = vsel %vm386_vm7, %v413_v19, %v422_v22  ;;  %v2840_v33 = vld [vmem:[#allocation3 + $0x54] sm:$0xf0]  ;;  %v2543_v31 = vld [vmem:[#allocation3 + $0x58] sm:$0xf0]  ;;  %426 = vst [vmem:[#allocation3 + $0x28] sm:$0xff] %v421_v60 }
 0x1a2   : > { %427 = vst [vmem:[#allocation3 + $0x38] sm:$0xff] %v423_v26  ;;  %v2542_v18 = vor.u32 %v2840_v33, %v2541_v28  ;;  %v2546_v29 = vor.u32 %v2838_v32, %v2543_v31 }
 0x1a4   : > { %1270 = vmatpush.bf16.msra.mxu1 %v2542_v18  ;;  %1298 = vmatpush.bf16.msra.mxu3 %v2546_v29  ;;  %v340_v37 = vpop.permute.xlu0 %339 }
 0x1a5   : > { %v342_v55 = vpop.permute.xlu1 %341  ;;  %v347_v21 = vrot.slane %v340_v37, 4 }
 0x1a6   : > { %v348_v34 = vrot.slane %v342_v55, 4 }
 0x1a8   : > { %v351_v39 = vsel %vm309_vm4, %v347_v21, %v348_v34  ;;  %v2525_v51 = vld [vmem:[#allocation3 + $0x28] sm:$0xf]  ;;  %v2834_v56 = vld [vmem:[#allocation3 + $0x2c] sm:$0xf] }
 0x1a9   : > { %v2836_v15 = vld [vmem:[#allocation3 + $0x34] sm:$0xf0]  ;;  %v2527_v46 = vld [vmem:[#allocation3 + $0x38] sm:$0xf0]  ;;  %v352_v49 = vsel %vm311_vm2, %v340_v37, %v351_v39 }
 0x1aa   : > { %357 = vst [vmem:[#allocation3 + $0x8] sm:$0xff] %v352_v49  ;;  %v2526_v44 = vor.u32 %v2836_v15, %v2525_v51  ;;  %v2530_v58 = vor.u32 %v2834_v56, %v2527_v46 }
 0x1ac   : > { %1271 = vmatpush.bf16.msra.mxu1 %v2526_v44  ;;  %1299 = vmatpush.bf16.msra.mxu3 %v2530_v58  ;;  %v346_v63 = vpop.permute.xlu0 %345 }
 0x1ad   : > { %v350_v2 = vrot.slane %v346_v63, 4  ;;  %v1009_v7 = vpop.permute.xlu1 %1008 }
 0x1af   : > { %v353_v10 = vsel %vm309_vm4, %v349_v53, %v350_v2 }
 0x1b0   : > { %v354_v3 = vsel %vm311_vm2, %v344_v61, %v353_v10 }
 0x1b1   : > { %358 = vst [vmem:[#allocation3 + $0x18] sm:$0xff] %v354_v3  ;;  %v2509_v42 = vld [vmem:[#allocation3 + $0x8] sm:$0xf]  ;;  %v2830_v4 = vld [vmem:[#allocation3 + $0xc] sm:$0xf] }
 0x1b8   : > { %v2832_v9 = vld [vmem:[#allocation3 + $0x14] sm:$0xf0]  ;;  %v2511_v30 = vld [vmem:[#allocation3 + $0x18] sm:$0xf0] }
 0x1b9   : > { %v2510_v6 = vor.u32 %v2832_v9, %v2509_v42  ;;  %v2514_v0 = vor.u32 %v2830_v4, %v2511_v30 }
 0x1bb   : > { %1272 = vmatpush.bf16.msra.mxu1 %v2510_v6  ;;  %1300 = vmatpush.bf16.msra.mxu3 %v2514_v0 }
 0x1be   : > { %1273 = vmatmul.bf16.vlgmr.msra.gmra.mxu1 %v3700_v40  ;;  %1301 = vmatmul.bf16.vlgmr.msra.gmra.mxu3 %v3700_v40  ;;  %v3731_v40 = vpop.permute.xlu2 %1013 }
 0x1e9   : > { %v1232_v5 = vpop.f32.mrf.mxu2 }
 0x1ea   : > { %v1260_v11 = vpop.f32.mrf.mxu3 }
 0x1f1   : > { %v1234_v12 = vpop.f32.mrf.mxu2 }
 0x1f2   : > { %v1262_v33 = vpop.f32.mrf.mxu3 }
 0x20a   : > { %v1288_v3 = vpop.f32.mrf.mxu3 }
 0x20c   : > { %v1218_v17 = vpop.f32.mrf.mxu0 }
 0x20d   : > { %v1219_v43 = vadd.f32 %v1218_v17, %v1009_v7 }
 0x20f   : > { %v1233_v8 = vadd.f32 %v1232_v5, %v1219_v43 }
 0x211   : > { %v3725_v48 = vmax.f32 %v1233_v8, 0.0 }
 0x212   : > { %v1290_v42 = vpop.f32.mrf.mxu3 }
 0x213   : > { %1329 = vst [vmem:[%s3727_s9] sm:$0xff] %v3725_v48  ;;  %v3746_v31 = vmul.f32 %v3725_v48, %v3321_v25  ;;  %v3754_v29 = vmul.f32 %v3725_v48, %v3319_v24  ;;  %v1432_v46 = vpack.c.bf16 %v3725_v48, %v3106_v20 }
 0x214   : > { %v1246_v19 = vpop.f32.mrf.mxu2  ;;  %v1220_v16 = vpop.f32.mrf.mxu0 }
 0x215   : > { %v1247_v54 = vadd.f32 %v1246_v19, %v1009_v7  ;;  %v1221_v13 = vadd.f32 %v1220_v16, %v3731_v40  ;;  %1440 = vrot.lane.b32.xlu0 %v1432_v46, %s3107_s25 }
 0x217   : > { %v1261_v22 = vadd.f32 %v1260_v11, %v1247_v54  ;;  %v1235_v26 = vadd.f32 %v1234_v12, %v1221_v13 }
 0x219   : > { %v3734_v27 = vmax.f32 %v1261_v22, 0.0  ;;  %v3736_v28 = vmax.f32 %v1235_v26, 0.0  ;;  %v1581_v26 = vmul.f32 %v3725_v48, %v3402_v1 }
 0x21b   : > { %1330 = vst [vmem:[%s3727_s9 + $0x8] sm:$0xff] %v3734_v27  ;;  %v3742_v32 = vpack.c.bf16 %v3734_v27, %v3725_v48  ;;  %v3750_v18 = vmul.f32 %v3734_v27, %v3398_v62  ;;  %v3758_v55 = vmul.f32 %v3734_v27, %v3361_v47  ;;  %v3776_v49 = vmul.f32 %v3736_v28, %v3317_v23 }
 0x21c   : > { %v1248_v60 = vpop.f32.mrf.mxu2  ;;  %1331 = vst [vmem:[%s3727_s9 + $0x10] sm:$0xff] %v3736_v28  ;;  %v3789_v44 = vmul.f32 %v3736_v28, %v3319_v24  ;;  %v3797_v61 = vmul.f32 %v3736_v28, %v3321_v25  ;;  %v1316_v6 = vpop.f32.mrf.mxu0 }
 0x21d   : > { %v1249_v34 = vadd.f32 %v1248_v60, %v3731_v40  ;;  %1660 = vst [vmem:[#allocation3 + $0x80] sm:$0xff] %v3742_v32  ;;  %v1910_v37 = vpack.c.bf16 %v3750_v18, %v3746_v31  ;;  %v1762_v21 = vpack.c.bf16 %v3758_v55, %v3754_v29  ;;  %v1356_v31 = vmul.f32 %v3736_v28, %v3488_v57 }
 0x21e   : > { %v1434_v18 = vpack.c.bf16 %v3736_v28, %v3106_v20 }
 0x21f   : > { %v1263_v39 = vadd.f32 %v1262_v33, %v1249_v34  ;;  %v1677_v33 = vmul.f32 %v3734_v27, %v3375_v52 }
 0x221   : > { %v3768_v15 = vmax.f32 %v1263_v39, 0.0 }
 0x223   : > { %1332 = vst [vmem:[%s3727_s9 + $0x18] sm:$0xff] %v3768_v15  ;;  %v3780_v51 = vmul.f32 %v3768_v15, %v3375_v52  ;;  %v3784_v56 = vpack.c.bf16 %v3768_v15, %v3736_v28  ;;  %v3793_v58 = vmul.f32 %v3768_v15, %v3361_v47  ;;  %v3801_v63 = vmul.f32 %v3768_v15, %v3398_v62 }
 0x225   : > { %v1684_v53 = vpack.c.bf16 %v3780_v51, %v3776_v49  ;;  %1661 = vst [vmem:[#allocation3 + $0x90] sm:$0xff] %v3784_v56  ;;  %v1764_v2 = vpack.c.bf16 %v3793_v58, %v3789_v44  ;;  %v1912_v10 = vpack.c.bf16 %v3801_v63, %v3797_v61  ;;  %v4015_v44 = vpop.permute.xlu1 %1846 }
 0x23b   : > { %v1274_v9 = vpop.f32.mrf.mxu1 }
 0x23c   : > { %v1275_v4 = vadd.f32 %v1274_v9, %v1009_v7 }
 0x23e   : > { %v1289_v30 = vadd.f32 %v1288_v3, %v1275_v4  ;;  %v1318_v3 = vpop.f32.mrf.mxu0 }
 0x240   : > { %v3810_v0 = vmax.f32 %v1289_v30, 0.0 }
 0x241   : > { %v1302_v5 = vpop.f32.mrf.mxu3 }
 0x242   : > { %2647 = vst [vmem:[%s3727_s9 + $0x20] sm:$0xff] %v3810_v0  ;;  %v1303_v12 = vadd.f32 %v1302_v5, %v1009_v7  ;;  %v1466_v17 = vpack.c.bf16 %v3810_v0, %v3106_v20  ;;  %v1621_v43 = vmul.f32 %v3810_v0, %v3402_v1  ;;  %v1541_v8 = vmul.f32 %v3810_v0, %v3427_v38 }
 0x243   : > { %v1276_v11 = vpop.f32.mrf.mxu1  ;;  %v3850_v9 = vmul.f32 %v3810_v0, %v3317_v23  ;;  %v1676_v5 = vmul.f32 %v3725_v48, %v3317_v23 }
 0x244   : > { %v1277_v19 = vadd.f32 %v1276_v11, %v3731_v40  ;;  %v1317_v54 = vadd.f32 %v1316_v6, %v1303_v12  ;;  %1474 = vrot.lane.b32.xlu1 %v1466_v17, %s3107_s25  ;;  %v1626_v16 = vpack.c.bf16 %v1621_v43, %v3411_v14  ;;  %v1546_v7 = vpack.c.bf16 %v1541_v8, %v3433_v45 }
 0x245   : > { %v1586_v6 = vpack.c.bf16 %v1581_v26, %v3411_v14  ;;  %v1682_v8 = vpack.c.bf16 %v1677_v33, %v1676_v5  ;;  %v1584_v5 = vmul.f32 %v3736_v28, %v3402_v1 }
 0x246   : > { %v1291_v13 = vadd.f32 %v1290_v42, %v1277_v19  ;;  %v3824_v22 = vmax.f32 %v1317_v54, 0.0  ;;  %1634 = vrot.lane.b32.xlu2 %v1626_v16, %s3098_s26  ;;  %1554 = vrot.lane.b32.xlu0 %v1546_v7, %s3099_s29  ;;  %v3846_v42 = vmul.f32 %v3810_v0, %v3319_v24  ;;  %v1501_v54 = vmul.f32 %v3725_v48, %v3427_v38 }
 0x247   : > { %v1582_v16 = vmul.f32 %v3734_v27, %v3335_v36 }
 0x248   : > { %v3830_v60 = vmax.f32 %v1291_v13, 0.0  ;;  %2648 = vst [vmem:[%s3727_s9 + $0x28] sm:$0xff] %v3824_v22  ;;  %v3838_v34 = vpack.c.bf16 %v3824_v22, %v3810_v0  ;;  %v3842_v39 = vmul.f32 %v3824_v22, %v3361_v47  ;;  %v3854_v4 = vmul.f32 %v3824_v22, %v3375_v52 }
 0x249   : > { %v1304_v46 = vpop.f32.mrf.mxu3  ;;  %v3874_v11 = vmul.f32 %v3824_v22, %v3398_v62  ;;  %v1467_v49 = vpack.c.bf16 %v3824_v22, %v3824_v22  ;;  %v1622_v58 = vmul.f32 %v3824_v22, %v3335_v36 }
 0x24a   : > { %2649 = vst [vmem:[%s3727_s9 + $0x30] sm:$0xff] %v3830_v60  ;;  %v1305_v30 = vadd.f32 %v1304_v46, %v3731_v40  ;;  %v1802_v12 = vpack.c.bf16 %v3842_v39, %v3846_v42  ;;  %v1722_v17 = vpack.c.bf16 %v3854_v4, %v3850_v9  ;;  %v3870_v40 = vmul.f32 %v3810_v0, %v3321_v25  ;;  %v4031_v39 = vpop.permute.xlu1 %1776 }
 0x24b   : > { %1668 = vst [vmem:[#allocation3 + $0x88] sm:$0xff] %v3838_v34  ;;  %v3887_v7 = vmul.f32 %v3830_v60, %v3319_v24  ;;  %v3903_v33 = vmul.f32 %v3830_v60, %v3317_v23  ;;  %v3911_v46 = vmul.f32 %v3830_v60, %v3321_v25  ;;  %v1587_v25 = vpack.c.bf16 %v1582_v16, %v1582_v16 }
 0x24c   : > { %v1319_v43 = vadd.f32 %v1318_v3, %v1305_v30  ;;  %1594 = vrot.lane.b32.xlu1 %v1586_v6, %s3098_s26  ;;  %v1950_v13 = vpack.c.bf16 %v3874_v11, %v3870_v40  ;;  %v1506_v30 = vpack.c.bf16 %v1501_v54, %v3433_v45  ;;  %v1353_v6 = vmul.f32 %v3725_v48, %v3488_v57 }
 0x24d   : > { %v1502_v54 = vmul.f32 %v3734_v27, %v3347_v41  ;;  %v1504_v48 = vmul.f32 %v3736_v28, %v3427_v38  ;;  %v1433_v16 = vpack.c.bf16 %v3734_v27, %v3734_v27  ;;  %v3976_v28 = vpop.permute.xlu2 %1772  ;;  %v1396_v40 = vmul.f32 %v3830_v60, %v3488_v57 }
 0x24e   : > { %v3876_v19 = vmax.f32 %v1319_v43, 0.0  ;;  %1690 = vrot.lane.b32.xlu2 %v1682_v8, %s3101_s22  ;;  %1844 = vrot.lane.b32.xlu0 %v3742_v32, %s3104_s7  ;;  %v1358_v43 = vpack.c.bf16 %v1353_v6, %v3491_v59  ;;  %v1588_v8 = vpack.c.bf16 %v1584_v5, %v3411_v14  ;;  %v1354_v6 = vmul.f32 %v3734_v27, %v3371_v50 }
 0x250   : > { %2650 = vst [vmem:[%s3727_s9 + $0x38] sm:$0xff] %v3876_v19  ;;  %v3895_v26 = vpack.c.bf16 %v3876_v19, %v3830_v60  ;;  %v3899_v32 = vmul.f32 %v3876_v19, %v3361_v47  ;;  %v3907_v24 = vmul.f32 %v3876_v19, %v3375_v52  ;;  %v3915_v3 = vmul.f32 %v3876_v19, %v3398_v62 }
 0x251   : > { %v1468_v62 = vpack.c.bf16 %v3830_v60, %v3106_v20  ;;  %v1359_v29 = vpack.c.bf16 %v1354_v6, %v1354_v6  ;;  %v1544_v20 = vmul.f32 %v3830_v60, %v3427_v38  ;;  %v1585_v38 = vmul.f32 %v3768_v15, %v3335_v36 }
 0x252   : > { %1669 = vst [vmem:[#allocation3 + $0x98] sm:$0xff] %v3895_v26  ;;  %v1804_v23 = vpack.c.bf16 %v3899_v32, %v3887_v7  ;;  %v1724_v47 = vpack.c.bf16 %v3907_v24, %v3903_v33  ;;  %v1952_v52 = vpack.c.bf16 %v3915_v3, %v3911_v46  ;;  %v1545_v4 = vmul.f32 %v3876_v19, %v3347_v41  ;;  %v2654_v46 = vld [vmem:[%s4299_s3 + $0x18] sm:$0xff] }
 0x253   : > { %v1589_v55 = vpack.c.bf16 %v1585_v38, %v1585_v38  ;;  %v1469_v33 = vpack.c.bf16 %v3876_v19, %v3876_v19  ;;  %v1400_v6 = vpack.c.bf16 %v1396_v40, %v3491_v59 }
 0x254   : > { %1514 = vrot.lane.b32.xlu1 %v1506_v30, %s3099_s29  ;;  %v1507_v30 = vpack.c.bf16 %v1502_v54, %v1502_v54  ;;  %v4045_v54 = vpop.permute.xlu1 %1880 }
 0x256   : > { %1596 = vrot.lane.b32.xlu2 %v1587_v25, %s3098_s26  ;;  %1478 = vrot.lane.b32.xlu0 %v1468_v62, %s3107_s25  ;;  %v1508_v25 = vpack.c.bf16 %v1504_v48, %v3433_v45  ;;  %v1624_v62 = vmul.f32 %v3830_v60, %v3402_v1  ;;  %v1548_v1 = vpack.c.bf16 %v1544_v20, %v3433_v45 }
 0x257   : > { %v1549_v48 = vpack.c.bf16 %v1545_v4, %v1545_v4 }
 0x258   : > { %v1628_v5 = vpack.c.bf16 %v1624_v62, %v3411_v14  ;;  %v1435_v14 = vpack.c.bf16 %v3768_v15, %v3768_v15 }
 0x25c   : > { %1366 = vrot.lane.b32.xlu1 %v1358_v43, %s3100_s10  ;;  %v3968_v43 = vpop.permute.xlu0 %1850  ;;  %v4064_v32 = vpop.permute.xlu1 %1812 }
 0x25e   : > { %1918 = vrot.lane.b32.xlu2 %v1910_v37, %s3103_s5  ;;  %1598 = vrot.lane.b32.xlu0 %v1588_v8, %s3098_s26  ;;  %v1360_v37 = vpack.c.bf16 %v1356_v31, %v3491_v59 }
 0x264   : > { %1442 = vrot.lane.b32.xlu1 %v1433_v16, %s3107_s25  ;;  %v1693_v27 = vpop.permute.xlu0 %1692 }
 0x266   : > { %1516 = vrot.lane.b32.xlu2 %v1507_v30, %s3099_s29  ;;  %1518 = vrot.lane.b32.xlu0 %v1508_v25, %s3099_s29 }
 0x26c   : > { %1770 = vrot.lane.b32.xlu1 %v1762_v21, %s3102_s30  ;;  %v3989_v21 = vpop.permute.xlu2 %1696  ;;  %v3998_v45 = vpop.permute.xlu0 %1884 }
 0x26e   : > { %1444 = vrot.lane.b32.xlu2 %v1434_v18, %s3107_s25  ;;  %1370 = vrot.lane.b32.xlu0 %v1360_v37, %s3100_s10  ;;  %v1625_v18 = vmul.f32 %v3876_v19, %v3335_v36  ;;  %v1397_v36 = vmul.f32 %v3876_v19, %v3371_v50 }
 0x270   : > { %v1629_v24 = vpack.c.bf16 %v1625_v18, %v1625_v18  ;;  %v1401_v20 = vpack.c.bf16 %v1397_v36, %v1397_v36 }
 0x274   : > { %1638 = vrot.lane.b32.xlu1 %v1628_v5, %s3098_s26  ;;  %v4006_v51 = vpop.permute.xlu2 %1924  ;;  %v1921_v61 = vpop.permute.xlu0 %1920 }
 0x275   : > { %v1927_v37 = vrot.slane %v1921_v61, 4 }
 0x276   : > { %1368 = vrot.lane.b32.xlu2 %v1359_v29, %s3100_s10  ;;  %1878 = vrot.lane.b32.xlu0 %v3838_v34, %s3104_s7  ;;  %v1394_v34 = vmul.f32 %v3824_v22, %v3371_v50 }
 0x278   : > { %v1399_v8 = vpack.c.bf16 %v1394_v34, %v1394_v34 }
 0x27c   : > { %1694 = vrot.lane.b32.xlu1 %v1684_v53, %s3101_s22  ;;  %v1627_v53 = vpack.c.bf16 %v1622_v58, %v1622_v58 }
 0x27e   : > { %1558 = vrot.lane.b32.xlu2 %v1548_v1, %s3099_s29  ;;  %1446 = vrot.lane.b32.xlu0 %v1435_v14, %s3107_s25 }
 0x284   : > { %1600 = vrot.lane.b32.xlu1 %v1589_v55, %s3098_s26 }
 0x286   : > { %1848 = vrot.lane.b32.xlu2 %v3784_v56, %s3104_s7  ;;  %1774 = vrot.lane.b32.xlu0 %v1764_v2, %s3102_s30  ;;  %v1505_v56 = vmul.f32 %v3768_v15, %v3347_v41  ;;  %v1357_v2 = vmul.f32 %v3768_v15, %v3371_v50  ;;  %v1542_v15 = vmul.f32 %v3824_v22, %v3347_v41  ;;  %v1699_v41 = vrot.slane %v1693_v27, 4 }
 0x287   : > { %v1853_v50 = vrot.slane %v4015_v44, 4 }
 0x288   : > { %v1509_v63 = vpack.c.bf16 %v1505_v56, %v1505_v56  ;;  %v1361_v42 = vpack.c.bf16 %v1357_v2, %v1357_v2  ;;  %v2653_v2 = vld [vmem:[%s4299_s3 + $0x10] sm:$0xff] }
 0x28c   : > { %1922 = vrot.lane.b32.xlu1 %v1912_v10, %s3103_s5  ;;  %v4027_v10 = vpop.permute.xlu2 %1736 }
 0x28e   : > { %1476 = vrot.lane.b32.xlu2 %v1467_v49, %s3107_s25  ;;  %1810 = vrot.lane.b32.xlu0 %v1802_v12, %s3102_s30  ;;  %v4033_v12 = vpop.permute.xlu0 %1816 }
 0x294   : > { %1520 = vrot.lane.b32.xlu1 %v1509_v63, %s3099_s29 }
 0x296   : > { %1730 = vrot.lane.b32.xlu2 %v1722_v17, %s3101_s22  ;;  %1636 = vrot.lane.b32.xlu0 %v1627_v53, %s3098_s26  ;;  %v1547_v17 = vpack.c.bf16 %v1542_v15, %v1542_v15  ;;  %v4048_v16 = vpop.permute.xlu0 %1732 }
 0x29c   : > { %1372 = vrot.lane.b32.xlu1 %v1361_v42, %s3100_s10 }
 0x29e   : > { %1882 = vrot.lane.b32.xlu2 %v3895_v26, %s3104_s7  ;;  %1408 = vrot.lane.b32.xlu0 %v1399_v8, %s3100_s10  ;;  %v1393_v26 = vmul.f32 %v3810_v0, %v3488_v57  ;;  %v4071_v0 = vpop.permute.xlu0 %1440 }
 0x2a0   : > { %v4041_v9 = vpop.permute.xlu2 %1634  ;;  %v1398_v7 = vpack.c.bf16 %v1393_v26, %v3491_v59 }
 0x2a4   : > { %1556 = vrot.lane.b32.xlu1 %v1547_v17, %s3099_s29 }
 0x2a6   : > { %1814 = vrot.lane.b32.xlu2 %v1804_v23, %s3102_s30  ;;  %1560 = vrot.lane.b32.xlu0 %v1549_v48, %s3099_s29  ;;  %v1448_v48 = vrot.slane %v4071_v0, 4 }
 0x2a8   : > { %v1691_v22 = vpop.permute.xlu2 %1690 }
 0x2a9   : > { %v1698_v30 = vrot.slane %v1691_v22, 4 }
 0x2ab   : > { %v1702_v25 = vsel %vm309_vm4, %v1698_v30, %v1699_v41 }
 0x2ac   : > { %v1703_v31 = vsel %vm531_vm3, %v1691_v22, %v1702_v25  ;;  %1734 = vrot.lane.b32.xlu1 %v1724_v47, %s3101_s22 }
 0x2ad   : > { %1708 = vst [vmem:[#allocation3 + $0xa0] sm:$0xff] %v1703_v31 }
 0x2ae   : > { %1406 = vrot.lane.b32.xlu2 %v1398_v7, %s3100_s10  ;;  %1958 = vrot.lane.b32.xlu0 %v1950_v13, %s3103_s5  ;;  %v1779_v7 = vrot.slane %v3976_v28, 4 }
 0x2b0   : > { %v1597_v23 = vpop.permute.xlu2 %1596 }
 0x2b1   : > { %v1603_v57 = vrot.slane %v1597_v23, 4 }
 0x2b4   : > { %1480 = vrot.lane.b32.xlu1 %v1469_v33, %s3107_s25 }
 0x2b6   : > { %v4078_v47 = vpop.permute.xlu1 %1474  ;;  %1640 = vrot.lane.b32.xlu2 %v1629_v24, %s3098_s26  ;;  %1964 = vrot.lane.b32.xlu0 %v3333_v35, %s3103_s5  ;;  %v1855_v24 = vrot.slane %v3968_v43, 4 }
 0x2b8   : > { %v4085_v11 = vpop.permute.xlu0 %1554  ;;  %v1919_v13 = vpop.permute.xlu2 %1918 }
 0x2b9   : > { %v1926_v62 = vrot.slane %v1919_v13, 4 }
 0x2bb   : > { %v1930_v5 = vsel %vm309_vm4, %v1926_v62, %v1927_v37 }
 0x2bc   : > { %v1931_v29 = vsel %vm278_vm8, %v1919_v13, %v1930_v5  ;;  %1410 = vrot.lane.b32.xlu1 %v1400_v6, %s3100_s10  ;;  %v1887_v5 = vrot.slane %v4045_v54, 4 }
 0x2bd   : > { %1936 = vst [vmem:[#allocation3 + $0x100] sm:$0xff] %v1931_v29  ;;  %v1482_v29 = vrot.slane %v4078_v47, 4 }
 0x2be   : > { %v1595_v1 = vpop.permute.xlu1 %1594  ;;  %1412 = vrot.lane.b32.xlu2 %v1401_v20, %s3100_s10 }
 0x2bf   : > { %v1602_v60 = vrot.slane %v1595_v1, 4 }
 0x2c0   : > { %v1845_v14 = vpop.permute.xlu0 %1844  ;;  %v1517_v27 = vpop.permute.xlu2 %1516 }
 0x2c1   : > { %v1606_v19 = vsel %vm309_vm4, %v1602_v60, %v1603_v57  ;;  %v1852_v59 = vrot.slane %v1845_v14, 4  ;;  %v1523_v44 = vrot.slane %v1517_v27, 4 }
 0x2c2   : > { %v1607_v38 = vsel %vm563_vm1, %v1595_v1, %v1606_v19 }
 0x2c3   : > { %1612 = vst [vmem:[#allocation3 + $0x60] sm:$0xff] %v1607_v38  ;;  %v1856_v55 = vsel %vm309_vm4, %v1852_v59, %v1853_v50 }
 0x2c4   : > { %v1857_v49 = vsel %vm834_vm5, %v1845_v14, %v1856_v55  ;;  %1960 = vrot.lane.b32.xlu1 %v3333_v35, %s3103_s5 }
 0x2c5   : > { %1862 = vst [vmem:[#allocation3 + $0xe0] sm:$0xff] %v1857_v49  ;;  %v1701_v49 = vrot.slane %v3989_v21, 4 }
 0x2c6   : > { %v1515_v56 = vpop.permute.xlu1 %1514  ;;  %1962 = vrot.lane.b32.xlu2 %v1952_v52, %s3103_s5 }
 0x2c7   : > { %v1522_v58 = vrot.slane %v1515_v56, 4 }
 0x2c8   : > { %v4105_v61 = vpop.permute.xlu0 %1478  ;;  %v4107_v63 = vpop.permute.xlu2 %1444 }
 0x2c9   : > { %v1526_v53 = vsel %vm309_vm4, %v1522_v58, %v1523_v44  ;;  %v1739_v44 = vrot.slane %v4048_v16, 4 }
 0x2ca   : > { %v1527_v35 = vsel %vm473_vm0, %v1515_v56, %v1526_v53 }
 0x2cb   : > { %1532 = vst [vmem:[#allocation3 + $0x40] sm:$0xff] %v1527_v35 }
 0x2cc   : > { %2022 = vperm.xlu1 %2988, %v2653_v2   ;;  %v2777_v60 = vld [vmem:[#allocation3 + $0xe0] sm:$0xf]  ;;  %v2895_v19 = vld [vmem:[#allocation3 + $0xe4] sm:$0xf]  ;;  %v1450_v2 = vrot.slane %v4107_v63, 4 }
 0x2ce   : > { %v1367_v3 = vpop.permute.xlu1 %1366  ;;  %2027 = vperm.xlu2 %2989, %v2654_v46  }
 0x2cf   : > { %v1374_v42 = vrot.slane %v1367_v3, 4 }
 0x2d0   : > { %v4117_v52 = vpop.permute.xlu0 %1598  ;;  %v1369_v34 = vpop.permute.xlu2 %1368 }
 0x2d1   : > { %v1375_v8 = vrot.slane %v1369_v34, 4 }
 0x2d3   : > { %v1378_v15 = vsel %vm309_vm4, %v1374_v42, %v1375_v8 }
 0x2d4   : > { %v1379_v4 = vsel %vm311_vm2, %v1367_v3, %v1378_v15  ;;  %v1604_v15 = vrot.slane %v4117_v52, 4 }
 0x2d5   : > { %1384 = vst [vmem:[#allocation3] sm:$0xff] %v1379_v4 }
 0x2d6   : > { %v1443_v17 = vpop.permute.xlu1 %1442 }
 0x2d7   : > { %v1449_v22 = vrot.slane %v1443_v17, 4  ;;  %v1781_v17 = vrot.slane %v4031_v39, 4 }
 0x2d8   : > { %v4122_v26 = vpop.permute.xlu0 %1518  ;;  %v4124_v41 = vpop.permute.xlu2 %1558 }
 0x2d9   : > { %v1452_v30 = vsel %vm309_vm4, %v1448_v48, %v1449_v22 }
 0x2da   : > { %v1453_v25 = vsel %vm386_vm7, %v4071_v0, %v1452_v30  ;;  %v1889_v30 = vrot.slane %v3998_v45, 4  ;;  %v1929_v45 = vrot.slane %v4006_v51, 4 }
 0x2db   : > { %1458 = vst [vmem:[#allocation3 + $0x20] sm:$0xff] %v1453_v25 }
 0x2de   : > { %v1771_v31 = vpop.permute.xlu1 %1770 }
 0x2df   : > { %v1778_v23 = vrot.slane %v1771_v31, 4 }
 0x2e0   : > { %v4130_v18 = vpop.permute.xlu0 %1370  ;;  %v1849_v33 = vpop.permute.xlu2 %1848 }
 0x2e1   : > { %v1782_v40 = vsel %vm309_vm4, %v1778_v23, %v1779_v7  ;;  %v1854_v13 = vrot.slane %v1849_v33, 4 }
 0x2e2   : > { %v1783_v36 = vsel %vm441_vm6, %v1771_v31, %v1782_v40 }
 0x2e3   : > { %1788 = vst [vmem:[#allocation3 + $0xc0] sm:$0xff] %v1783_v36  ;;  %v1858_v37 = vsel %vm309_vm4, %v1854_v13, %v1855_v24  ;;  %v1819_v36 = vrot.slane %v4064_v32, 4 }
 0x2e4   : > { %v1859_v0 = vsel %vm834_vm5, %v1849_v33, %v1858_v37 }
 0x2e5   : > { %1863 = vst [vmem:[#allocation3 + $0xf0] sm:$0xff] %v1859_v0 }
 0x2e6   : > { %v4137_v62 = vpop.permute.xlu1 %1638 }
 0x2e8   : > { %v1879_v28 = vpop.permute.xlu0 %1878  ;;  %v1477_v6 = vpop.permute.xlu2 %1476 }
 0x2e9   : > { %v1886_v43 = vrot.slane %v1879_v28, 4  ;;  %v1483_v20 = vrot.slane %v1477_v6, 4 }
 0x2eb   : > { %v1890_v1 = vsel %vm309_vm4, %v1886_v43, %v1887_v5  ;;  %v1486_v57 = vsel %vm309_vm4, %v1482_v29, %v1483_v20 }
 0x2ec   : > { %v1891_v14 = vsel %vm834_vm5, %v1879_v28, %v1890_v1  ;;  %v1487_v27 = vsel %vm386_vm7, %v4078_v47, %v1486_v57  ;;  %v2897_v50 = vld [vmem:[#allocation3 + $0xec] sm:$0xf0]  ;;  %v2779_v59 = vld [vmem:[#allocation3 + $0xf0] sm:$0xf0]  ;;  %v2761_v1 = vld [vmem:[#allocation3 + $0xc0] sm:$0xf] }
 0x2ed   : > { %1896 = vst [vmem:[#allocation3 + $0xe8] sm:$0xff] %v1891_v14  ;;  %v2778_v38 = vor.u32 %v2897_v50, %v2777_v60  ;;  %v2782_v54 = vor.u32 %v2895_v19, %v2779_v59  ;;  %v2891_v60 = vld [vmem:[#allocation3 + $0xc4] sm:$0xf] }
 0x2ee   : > { %1492 = vst [vmem:[#allocation3 + $0x28] sm:$0xff] %v1487_v27  ;;  %v1695_v55 = vpop.permute.xlu1 %1694 }
 0x2ef   : > { %v1700_v56 = vrot.slane %v1695_v55, 4  ;;  %2222 = vmatpush.bf16.msra.mxu2 %v2778_v38  ;;  %2250 = vmatpush.bf16.msra.mxu0 %v2782_v54 }
 0x2f0   : > { %v1447_v58 = vpop.permute.xlu0 %1446  ;;  %v1731_v53 = vpop.permute.xlu2 %1730 }
 0x2f1   : > { %v1704_v47 = vsel %vm309_vm4, %v1700_v56, %v1701_v49  ;;  %v1451_v35 = vrot.slane %v1447_v58, 4  ;;  %v1738_v46 = vrot.slane %v1731_v53, 4  ;;  %v1642_v49 = vrot.slane %v4041_v9, 4 }
 0x2f2   : > { %v1705_v3 = vsel %vm531_vm3, %v1695_v55, %v1704_v47  ;;  %v1524_v56 = vrot.slane %v4122_v26, 4  ;;  %v2887_v47 = vld [vmem:[#allocation3 + $0xa4] sm:$0xf] }
 0x2f3   : > { %1709 = vst [vmem:[#allocation3 + $0xb0] sm:$0xff] %v1705_v3  ;;  %v1454_v34 = vsel %vm309_vm4, %v1450_v2, %v1451_v35  ;;  %v1742_v21 = vsel %vm309_vm4, %v1738_v46, %v1739_v44  ;;  %v2745_v2 = vld [vmem:[#allocation3 + $0xa0] sm:$0xf]  ;;  %v2885_v3 = vld [vmem:[#allocation3 + $0x8c] sm:$0xf0] }
 0x2f4   : > { %v1455_v42 = vsel %vm386_vm7, %v4107_v63, %v1454_v34  ;;  %v1743_v16 = vsel %vm531_vm3, %v1731_v53, %v1742_v21  ;;  %v2785_v50 = vld [vmem:[#allocation3 + $0xe8] sm:$0xf]  ;;  %v2793_v35 = vld [vmem:[#allocation3 + $0x100] sm:$0xf]  ;;  %v2883_v34 = vld [vmem:[#allocation3 + $0x84] sm:$0xf] }
 0x2f5   : > { %1459 = vst [vmem:[#allocation3 + $0x30] sm:$0xff] %v1455_v42  ;;  %v2729_v46 = vld [vmem:[#allocation3 + $0x80] sm:$0xf]  ;;  %v2731_v21 = vld [vmem:[#allocation3 + $0x90] sm:$0xf0] }
 0x2f6   : > { %1748 = vst [vmem:[#allocation3 + $0xa8] sm:$0xff] %v1743_v16  ;;  %v1601_v8 = vpop.permute.xlu1 %1600 }
 0x2f7   : > { %v1605_v4 = vrot.slane %v1601_v8, 4 }
 0x2f8   : > { %v1775_v48 = vpop.permute.xlu0 %1774  ;;  %v1883_v22 = vpop.permute.xlu2 %1882 }
 0x2f9   : > { %v1608_v25 = vsel %vm309_vm4, %v1604_v15, %v1605_v4  ;;  %v1780_v31 = vrot.slane %v1775_v48, 4  ;;  %v1888_v7 = vrot.slane %v1883_v22, 4  ;;  %v2865_v4 = vld [vmem:[%s4298_s2 + $0x14] sm:$0xf] }
 0x2fa   : > { %v1609_v63 = vsel %vm563_vm1, %v4117_v52, %v1608_v25  ;;  %v1821_v52 = vrot.slane %v4033_v12, 4  ;;  %v2889_v54 = vld [vmem:[#allocation3 + $0xac] sm:$0xf0]  ;;  %v2747_v55 = vld [vmem:[#allocation3 + $0xb0] sm:$0xf0] }
 0x2fb   : > { %1613 = vst [vmem:[#allocation3 + $0x70] sm:$0xff] %v1609_v63  ;;  %v1784_v23 = vsel %vm309_vm4, %v1780_v31, %v1781_v17  ;;  %v1892_v33 = vsel %vm309_vm4, %v1888_v7, %v1889_v30  ;;  %v2746_v8 = vor.u32 %v2889_v54, %v2745_v2  ;;  %v2750_v15 = vor.u32 %v2887_v47, %v2747_v55  ;;  %v2659_v17 = vld [vmem:[%s4298_s2 + $0x18] sm:$0xf0]  ;;  %v2899_v30 = vld [vmem:[#allocation3 + $0x104] sm:$0xf] }
 0x2fc   : > { %v1785_v24 = vsel %vm441_vm6, %v1775_v48, %v1784_v23  ;;  %v1893_v39 = vsel %vm834_vm5, %v1883_v22, %v1892_v33  ;;  %v2875_v2 = vld [vmem:[#allocation3 + $0x44] sm:$0xf] }
 0x2fd   : > { %1789 = vst [vmem:[#allocation3 + $0xd0] sm:$0xff] %v1785_v24  ;;  %v4191_v24 = vor.u32 %v2865_v4, %v2659_v17 }
 0x2fe   : > { %1897 = vst [vmem:[#allocation3 + $0xf8] sm:$0xff] %v1893_v39  ;;  %v1923_v40 = vpop.permute.xlu1 %1922 }
 0x2ff   : > { %v1928_v13 = vrot.slane %v1923_v40, 4 }
 0x300   : > { %v1811_v37 = vpop.permute.xlu0 %1810  ;;  %v1815_v0 = vpop.permute.xlu2 %1814 }
 0x301   : > { %v1932_v28 = vsel %vm309_vm4, %v1928_v13, %v1929_v45  ;;  %v1818_v6 = vrot.slane %v1811_v37, 4  ;;  %v1820_v5 = vrot.slane %v1815_v0, 4  ;;  %v2734_v45 = vor.u32 %v2883_v34, %v2731_v21 }
 0x302   : > { %v1933_v29 = vsel %vm278_vm8, %v1923_v40, %v1932_v28  ;;  %v2881_v40 = vld [vmem:[#allocation3 + $0x6c] sm:$0xf0]  ;;  %v1376_v28 = vrot.slane %v4130_v18, 4  ;;  %v1562_v34 = vrot.slane %v4085_v11, 4 }
 0x303   : > { %1937 = vst [vmem:[#allocation3 + $0x110] sm:$0xff] %v1933_v29  ;;  %v1822_v43 = vsel %vm309_vm4, %v1818_v6, %v1819_v36  ;;  %v1824_v20 = vsel %vm309_vm4, %v1820_v5, %v1821_v52  ;;  %v2715_v36 = vld [vmem:[#allocation3 + $0x70] sm:$0xf0]  ;;  %v2896_v52 = vld [vmem:[#allocation3 + $0xec] sm:$0xf] }
 0x304   : > { %v1823_v51 = vsel %vm441_vm6, %v1811_v37, %v1822_v43  ;;  %v1825_v32 = vsel %vm441_vm6, %v1815_v0, %v1824_v20  ;;  %v2893_v57 = vld [vmem:[#allocation3 + $0xcc] sm:$0xf0]  ;;  %v2763_v14 = vld [vmem:[#allocation3 + $0xd0] sm:$0xf0]  ;;  %v2713_v5 = vld [vmem:[#allocation3 + $0x60] sm:$0xf] }
 0x305   : > { %1828 = vst [vmem:[#allocation3 + $0xc8] sm:$0xff] %v1823_v51  ;;  %v2762_v12 = vor.u32 %v2893_v57, %v2761_v1  ;;  %v2766_v27 = vor.u32 %v2891_v60, %v2763_v14  ;;  %v2898_v19 = vld [vmem:[#allocation3 + $0xf4] sm:$0xf0]  ;;  %v2787_v39 = vld [vmem:[#allocation3 + $0xf8] sm:$0xf0]  ;;  %v1644_v43 = vrot.slane %v4137_v62, 4  ;;  %v2714_v51 = vor.u32 %v2881_v40, %v2713_v5 }
 0x306   : > { %1829 = vst [vmem:[#allocation3 + $0xd8] sm:$0xff] %v1825_v32  ;;  %v1521_v59 = vpop.permute.xlu1 %1520  ;;  %v2786_v38 = vor.u32 %v2898_v19, %v2785_v50  ;;  %v2879_v29 = vld [vmem:[#allocation3 + $0x64] sm:$0xf] }
 0x307   : > { %v1525_v44 = vrot.slane %v1521_v59, 4  ;;  %2223 = vmatpush.bf16.msra.mxu2 %v2762_v12  ;;  %2251 = vmatpush.bf16.msra.mxu0 %v2766_v27  ;;  %v2718_v32 = vor.u32 %v2879_v29, %v2715_v36 }
 0x308   : > { %2278 = vmatpush.bf16.msrb.mxu3 %v2786_v38  ;;  %v1637_v58 = vpop.permute.xlu0 %1636  ;;  %v4177_v53 = vpop.permute.xlu2 %1406 }
 0x309   : > { %v1528_v42 = vsel %vm309_vm4, %v1524_v56, %v1525_v44  ;;  %v1643_v16 = vrot.slane %v1637_v58, 4  ;;  %v1414_v14 = vrot.slane %v4177_v53, 4  ;;  %v2697_v58 = vld [vmem:[#allocation3 + $0x40] sm:$0xf] }
 0x30a   : > { %v1529_v48 = vsel %vm473_vm0, %v4122_v26, %v1528_v42  ;;  %v2901_v22 = vld [vmem:[#allocation3 + $0x10c] sm:$0xf0]  ;;  %v2795_v25 = vld [vmem:[#allocation3 + $0x110] sm:$0xf0]  ;;  %v2730_v26 = vor.u32 %v2885_v3, %v2729_v46 }
 0x30b   : > { %1533 = vst [vmem:[#allocation3 + $0x50] sm:$0xff] %v1529_v48  ;;  %v1646_v31 = vsel %vm309_vm4, %v1642_v49, %v1643_v16  ;;  %2224 = vmatpush.bf16.msra.mxu2 %v2746_v8  ;;  %2252 = vmatpush.bf16.msra.mxu0 %v2750_v15  ;;  %v2794_v7 = vor.u32 %v2901_v22, %v2793_v35  ;;  %v2873_v46 = vld [vmem:[#allocation3 + $0x2c] sm:$0xf0]  ;;  %v2683_v3 = vld [vmem:[#allocation3 + $0x30] sm:$0xf0] }
 0x30c   : > { %v2798_v63 = vor.u32 %v2899_v30, %v2795_v25  ;;  %v1647_v23 = vsel %vm563_vm1, %v4041_v9, %v1646_v31  ;;  %v2769_v33 = vld [vmem:[#allocation3 + $0xc8] sm:$0xf]  ;;  %v2790_v9 = vor.u32 %v2896_v52, %v2787_v39  ;;  %v2892_v57 = vld [vmem:[#allocation3 + $0xcc] sm:$0xf]  ;;  %v2681_v16 = vld [vmem:[#allocation3 + $0x20] sm:$0xf] }
 0x30d   : > { %1652 = vst [vmem:[#allocation3 + $0x68] sm:$0xff] %v1647_v23  ;;  %2243 = vmatpush.bf16.msrb.mxu1 %v2794_v7  ;;  %v2894_v13 = vld [vmem:[#allocation3 + $0xd4] sm:$0xf0]  ;;  %v2771_v60 = vld [vmem:[#allocation3 + $0xd8] sm:$0xf0]  ;;  %v2682_v4 = vor.u32 %v2873_v46, %v2681_v16 }
 0x30e   : > { %v1373_v37 = vpop.permute.xlu1 %1372  ;;  %v2770_v0 = vor.u32 %v2894_v13, %v2769_v33  ;;  %v2774_v49 = vor.u32 %v2892_v57, %v2771_v60  ;;  %v2657_v31 = vld [vmem:[%s4298_s2 + $0x10] sm:$0xf]  ;;  %v2866_v7 = vld [vmem:[%s4298_s2 + $0x14] sm:$0xf0]  ;;  %v2867_v33 = vld [vmem:[#allocation3 + $0x4] sm:$0xf] }
 0x30f   : > { %v1377_v6 = vrot.slane %v1373_v37, 4  ;;  %2225 = vmatpush.bf16.msra.mxu2 %v2730_v26  ;;  %2253 = vmatpush.bf16.msra.mxu0 %v2734_v45  ;;  %v4221_v45 = vor.u32 %v2866_v7, %v2657_v31  ;;  %v1741_v13 = vrot.slane %v4027_v10, 4  ;;  %v1484_v10 = vrot.slane %v4105_v61, 4  ;;  %v2872_v31 = vld [vmem:[#allocation3 + $0x2c] sm:$0xf] }
 0x310   : > { %2279 = vmatpush.bf16.msrb.mxu3 %v2770_v0  ;;  %v1409_v20 = vpop.permute.xlu0 %1408  ;;  %v1641_v1 = vpop.permute.xlu2 %1640  ;;  %2807 = vmatmul.msk.bf16.vlgmr.msrb.gmra.mxu1 %vm386_vm7, %v4191_v24 }
 0x311   : > { %2271 = vmatpush.bf16.msra.mxu1 %v2798_v63  ;;  %v1380_v12 = vsel %vm309_vm4, %v1376_v28, %v1377_v6  ;;  %v1415_v27 = vrot.slane %v1409_v20, 4  ;;  %v1645_v50 = vrot.slane %v1641_v1, 4  ;;  %v2753_v20 = vld [vmem:[#allocation3 + $0xa8] sm:$0xf] }
 0x312   : > { %v1381_v19 = vsel %vm311_vm2, %v4130_v18, %v1380_v12  ;;  %v2877_v59 = vld [vmem:[#allocation3 + $0x4c] sm:$0xf0]  ;;  %v2699_v38 = vld [vmem:[#allocation3 + $0x50] sm:$0xf0] }
 0x313   : > { %1385 = vst [vmem:[#allocation3 + $0x10] sm:$0xff] %v1381_v19  ;;  %v1418_v54 = vsel %vm309_vm4, %v1414_v14, %v1415_v27  ;;  %v1648_v55 = vsel %vm309_vm4, %v1644_v43, %v1645_v50  ;;  %2226 = vmatpush.bf16.msra.mxu2 %v2714_v51  ;;  %2254 = vmatpush.bf16.msra.mxu0 %v2718_v32  ;;  %v2888_v32 = vld [vmem:[#allocation3 + $0xac] sm:$0xf]  ;;  %v2886_v50 = vld [vmem:[#allocation3 + $0x94] sm:$0xf0] }
 0x314   : > { %v1419_v56 = vsel %vm311_vm2, %v4177_v53, %v1418_v54  ;;  %v1649_v44 = vsel %vm563_vm1, %v4137_v62, %v1648_v55  ;;  %v2698_v18 = vor.u32 %v2877_v59, %v2697_v58  ;;  %v2702_v47 = vor.u32 %v2875_v2, %v2699_v38  ;;  %v2871_v62 = vld [vmem:[#allocation3 + $0x24] sm:$0xf]  ;;  %v2739_v19 = vld [vmem:[#allocation3 + $0x98] sm:$0xf0]  ;;  %v2737_v38 = vld [vmem:[#allocation3 + $0x88] sm:$0xf] }
 0x315   : > { %2306 = vmatpush.bf16.msrb.mxu1 %v2790_v9  ;;  %1424 = vst [vmem:[#allocation3 + $0x8] sm:$0xff] %v1419_v56  ;;  %v1564_v53 = vrot.slane %v4124_v41, 4  ;;  %v2686_v17 = vor.u32 %v2871_v62, %v2683_v3  ;;  %v2884_v54 = vld [vmem:[#allocation3 + $0x8c] sm:$0xf] }
 0x316   : > { %1653 = vst [vmem:[#allocation3 + $0x78] sm:$0xff] %v1649_v44  ;;  %v1557_v35 = vpop.permute.xlu1 %1556  ;;  %v2742_v56 = vor.u32 %v2884_v54, %v2739_v19 }
 0x317   : > { %v1563_v21 = vrot.slane %v1557_v35, 4  ;;  %2227 = vmatpush.bf16.msra.mxu2 %v2698_v18  ;;  %2255 = vmatpush.bf16.msra.mxu0 %v2702_v47  ;;  %v2721_v47 = vld [vmem:[#allocation3 + $0x68] sm:$0xf]  ;;  %v2880_v35 = vld [vmem:[#allocation3 + $0x6c] sm:$0xf] }
 0x318   : > { %v1561_v42 = vpop.permute.xlu0 %1560  ;;  %v1413_v23 = vpop.permute.xlu2 %1412 }
 0x319   : > { %2307 = vmatpush.bf16.msrb.mxu1 %v2774_v49  ;;  %v1566_v8 = vsel %vm309_vm4, %v1562_v34, %v1563_v21  ;;  %v1565_v15 = vrot.slane %v1561_v42, 4  ;;  %v1417_v55 = vrot.slane %v1413_v23, 4  ;;  %v2738_v49 = vor.u32 %v2886_v50, %v2737_v38 }
 0x31a   : > { %v1567_v48 = vsel %vm473_vm0, %v4085_v11, %v1566_v8  ;;  %v2869_v22 = vld [vmem:[#allocation3 + $0xc] sm:$0xf0]  ;;  %v2667_v30 = vld [vmem:[#allocation3 + $0x10] sm:$0xf0]  ;;  %v2665_v11 = vld [vmem:[#allocation3] sm:$0xf] }
 0x31b   : > { %1572 = vst [vmem:[#allocation3 + $0x48] sm:$0xff] %v1567_v48  ;;  %v1568_v25 = vsel %vm309_vm4, %v1564_v53, %v1565_v15  ;;  %2228 = vmatpush.bf16.msra.mxu2 %v2682_v4  ;;  %2256 = vmatpush.bf16.msra.mxu0 %v2686_v17  ;;  %v2666_v39 = vor.u32 %v2869_v22, %v2665_v11 }
 0x31c   : > { %v1569_v63 = vsel %vm473_vm0, %v4124_v41, %v1568_v25  ;;  %v2670_v40 = vor.u32 %v2867_v33, %v2667_v30  ;;  %v2689_v25 = vld [vmem:[#allocation3 + $0x28] sm:$0xf] }
 0x31d   : > { %1573 = vst [vmem:[#allocation3 + $0x58] sm:$0xff] %v1569_v63  ;;  %v2882_v44 = vld [vmem:[#allocation3 + $0x74] sm:$0xf0]  ;;  %v2723_v58 = vld [vmem:[#allocation3 + $0x78] sm:$0xf0] }
 0x31e   : > { %v1735_v26 = vpop.permute.xlu1 %1734  ;;  %v2722_v46 = vor.u32 %v2882_v44, %v2721_v47  ;;  %v2726_v3 = vor.u32 %v2880_v35, %v2723_v58  ;;  %v2673_v33 = vld [vmem:[#allocation3 + $0x8] sm:$0xf] }
 0x31f   : > { %v1740_v36 = vrot.slane %v1735_v26, 4  ;;  %2229 = vmatpush.bf16.msra.mxu2 %v2666_v39  ;;  %2257 = vmatpush.bf16.msra.mxu0 %v2670_v40  ;;  %v2868_v39 = vld [vmem:[#allocation3 + $0xc] sm:$0xf] }
 0x320   : > { %v4224_v37 = vpop.permute.xlu0 %1958  ;;  %2808 = vmatmul.msk.bf16.vlgmr.msra.gmra.mxu1 %vm386_vm7, %v4191_v24  ;;  %v1963_v52 = vpop.permute.xlu2 %1962 }
 0x321   : > { %v1744_v41 = vsel %vm309_vm4, %v1740_v36, %v1741_v13  ;;  %v1968_v5 = vrot.slane %v1963_v52, 4  ;;  %v1966_v62 = vrot.slane %v4224_v37, 4 }
 0x322   : > { %v1745_v0 = vsel %vm531_vm3, %v1735_v26, %v1744_v41  ;;  %2230 = vmatmul.bf16.vlgmr.msra.gmra.mxu2 %v4221_v45  ;;  %2258 = vmatmul.bf16.vlgmr.msra.gmra.mxu0 %v4221_v45  ;;  %v2705_v42 = vld [vmem:[#allocation3 + $0x48] sm:$0xf]  ;;  %v2876_v16 = vld [vmem:[#allocation3 + $0x4c] sm:$0xf] }
 0x323   : > { %1749 = vst [vmem:[#allocation3 + $0xb8] sm:$0xff] %v1745_v0 }
 0x324   : > { %v2878_v34 = vld [vmem:[#allocation3 + $0x54] sm:$0xf0]  ;;  %v2707_v21 = vld [vmem:[#allocation3 + $0x58] sm:$0xf0] }
 0x325   : > { %v2706_v15 = vor.u32 %v2878_v34, %v2705_v42  ;;  %v2710_v4 = vor.u32 %v2876_v16, %v2707_v21 }
 0x326   : > { %v1481_v28 = vpop.permute.xlu1 %1480 }
 0x327   : > { %v1485_v6 = vrot.slane %v1481_v28, 4 }
 0x328   : > { %v1965_v9 = vpop.permute.xlu0 %1964 }
 0x329   : > { %v1488_v29 = vsel %vm309_vm4, %v1484_v10, %v1485_v6  ;;  %v1969_v43 = vrot.slane %v1965_v9, 4 }
 0x32a   : > { %v1489_v1 = vsel %vm386_vm7, %v4105_v61, %v1488_v29  ;;  %v2890_v51 = vld [vmem:[#allocation3 + $0xb4] sm:$0xf0]  ;;  %v2755_v57 = vld [vmem:[#allocation3 + $0xb8] sm:$0xf0] }
 0x32b   : > { %1493 = vst [vmem:[#allocation3 + $0x38] sm:$0xff] %v1489_v1  ;;  %v1972_v60 = vsel %vm309_vm4, %v1968_v5, %v1969_v43  ;;  %v2754_v14 = vor.u32 %v2890_v51, %v2753_v20  ;;  %v2758_v12 = vor.u32 %v2888_v32, %v2755_v57 }
 0x32c   : > { %v1973_v27 = vsel %vm278_vm8, %v1963_v52, %v1972_v60 }
 0x32d   : > { %1977 = vst [vmem:[#allocation3 + $0x118] sm:$0xff] %v1973_v27  ;;  %2280 = vmatpush.bf16.msrb.mxu3 %v2754_v14  ;;  %2308 = vmatpush.bf16.msrb.mxu1 %v2758_v12 }
 0x32e   : > { %v1411_v59 = vpop.permute.xlu1 %1410 }
 0x32f   : > { %v1416_v61 = vrot.slane %v1411_v59, 4 }
 0x331   : > { %v1420_v2 = vsel %vm309_vm4, %v1416_v61, %v1417_v55  ;;  %2281 = vmatpush.bf16.msrb.mxu3 %v2738_v49  ;;  %2309 = vmatpush.bf16.msrb.mxu1 %v2742_v56 }
 0x332   : > { %v1421_v18 = vsel %vm311_vm2, %v1411_v59, %v1420_v2  ;;  %v2874_v17 = vld [vmem:[#allocation3 + $0x34] sm:$0xf0]  ;;  %v2691_v48 = vld [vmem:[#allocation3 + $0x38] sm:$0xf0] }
 0x333   : > { %1425 = vst [vmem:[#allocation3 + $0x18] sm:$0xff] %v1421_v18  ;;  %v2690_v7 = vor.u32 %v2874_v17, %v2689_v25  ;;  %v2694_v63 = vor.u32 %v2872_v31, %v2691_v48 }
 0x334   : > { %v2902_v13 = vld [vmem:[#allocation3 + $0x114] sm:$0xf0]  ;;  %v2803_v0 = vld [vmem:[#allocation3 + $0x118] sm:$0xf0] }
 0x335   : > { %2282 = vmatpush.bf16.msrb.mxu3 %v2722_v46  ;;  %2310 = vmatpush.bf16.msrb.mxu1 %v2726_v3 }
 0x336   : > { %v1961_v53 = vpop.permute.xlu1 %1960 }
 0x337   : > { %v1967_v8 = vrot.slane %v1961_v53, 4 }
 0x339   : > { %v1970_v22 = vsel %vm309_vm4, %v1966_v62, %v1967_v8  ;;  %2283 = vmatpush.bf16.msrb.mxu3 %v2706_v15  ;;  %2311 = vmatpush.bf16.msrb.mxu1 %v2710_v4 }
 0x33a   : > { %v1971_v30 = vsel %vm278_vm8, %v4224_v37, %v1970_v22  ;;  %v2870_v23 = vld [vmem:[#allocation3 + $0x14] sm:$0xf0]  ;;  %v2675_v11 = vld [vmem:[#allocation3 + $0x18] sm:$0xf0] }
 0x33b   : > { %1976 = vst [vmem:[#allocation3 + $0x108] sm:$0xff] %v1971_v30  ;;  %v2674_v40 = vor.u32 %v2870_v23, %v2673_v33  ;;  %v2678_v26 = vor.u32 %v2868_v39, %v2675_v11 }
 0x33d   : > { %2284 = vmatpush.bf16.msrb.mxu3 %v2690_v7  ;;  %2312 = vmatpush.bf16.msrb.mxu1 %v2694_v63 }
 0x33e   : > { %v2023_v9 = vpop.permute.xlu1 %2022 }
 0x341   : > { %2285 = vmatpush.bf16.msrb.mxu3 %v2674_v40  ;;  %2313 = vmatpush.bf16.msrb.mxu1 %v2678_v26 }
 0x342   : > { %v2801_v36 = vld [vmem:[#allocation3 + $0x108] sm:$0xf]  ;;  %v2900_v41 = vld [vmem:[#allocation3 + $0x10c] sm:$0xf] }
 0x343   : > { %v2802_v37 = vor.u32 %v2902_v13, %v2801_v36  ;;  %v2806_v52 = vor.u32 %v2900_v41, %v2803_v0 }
 0x344   : > { %2286 = vmatmul.bf16.vlgmr.msrb.gmra.mxu3 %v4221_v45  ;;  %2314 = vmatmul.bf16.vlgmr.msrb.gmra.mxu1 %v4221_v45  ;;  %v2028_v45 = vpop.permute.xlu2 %2027 }
 0x345   : > { %2299 = vmatpush.bf16.msrb.mxu2 %v2802_v37  ;;  %2327 = vmatpush.bf16.msrb.mxu0 %v2806_v52 }
 0x348   : > { %2809 = vmatmul.msk.bf16.vlgmr.msrb.gmra.mxu2 %vm386_vm7, %v4191_v24  ;;  %2810 = vmatmul.msk.bf16.vlgmr.msrb.gmra.mxu0 %vm386_vm7, %v4191_v24 }
 0x38d   : > { %v2245_v28 = vpop.f32.mrf.mxu1 }
 0x395   : > { %v2247_v10 = vpop.f32.mrf.mxu1 }
 0x39d   : > { %v2273_v6 = vpop.f32.mrf.mxu1 }
 0x39f   : > { %v2259_v5 = vpop.f32.mrf.mxu0 }
 0x3a0   : > { %v2260_v29 = vadd.f32 %v2259_v5, %v2023_v9 }
 0x3a2   : > { %v2274_v43 = vadd.f32 %v2273_v6, %v2260_v29 }
 0x3a4   : > { %v2335_v20 = vmax.f32 %v2274_v43, 0.0 }
 0x3a5   : > { %v2231_v1 = vpop.f32.mrf.mxu2  ;;  %v2275_v57 = vpop.f32.mrf.mxu1 }
 0x3a6   : > { %2812 = vst [vmem:[%s3727_s9 + $0x48] sm:$0xff] %v2335_v20  ;;  %v2232_v51 = vadd.f32 %v2231_v1, %v2023_v9 }
 0x3a7   : > { %v2261_v32 = vpop.f32.mrf.mxu0 }
 0x3a8   : > { %v2246_v60 = vadd.f32 %v2245_v28, %v2232_v51  ;;  %v2262_v14 = vadd.f32 %v2261_v32, %v2028_v45 }
 0x3aa   : > { %v2334_v24 = vmax.f32 %v2246_v60, 0.0  ;;  %v2276_v12 = vadd.f32 %v2275_v57, %v2262_v14 }
 0x3ac   : > { %2811 = vst [vmem:[%s3727_s9 + $0x40] sm:$0xff] %v2334_v24  ;;  %v2339_v27 = vmax.f32 %v2276_v12, 0.0 }
 0x3ad   : > { %v2233_v50 = vpop.f32.mrf.mxu2 }
 0x3ae   : > { %2814 = vst [vmem:[%s3727_s9 + $0x58] sm:$0xff] %v2339_v27  ;;  %v2234_v19 = vadd.f32 %v2233_v50, %v2028_v45 }
 0x3b0   : > { %v2248_v59 = vadd.f32 %v2247_v10, %v2234_v19 }
 0x3b2   : > { %v2338_v38 = vmax.f32 %v2248_v59, 0.0 }
 0x3b4   : > { %2813 = vst [vmem:[%s3727_s9 + $0x50] sm:$0xff] %v2338_v38 }
 0x3c1   : > { %v2315_v54 = vpop.f32.mrf.mxu1 }
 0x3c2   : > { %v2316_v55 = vadd.f32 %v2315_v54, %v2023_v9 }
 0x3c5   : > { %v2329_v61 = vpop.f32.mrf.mxu0 }
 0x3c6   : > { %v2330_v49 = vadd.f32 %v2329_v61, %v2316_v55 }
 0x3c7   : > { %v2287_v56 = vpop.f32.mrf.mxu3 }
 0x3c8   : > { %v2337_v44 = vmax.f32 %v2330_v49, 0.0  ;;  %v2288_v2 = vadd.f32 %v2287_v56, %v2023_v9 }
 0x3c9   : > { %v2317_v58 = vpop.f32.mrf.mxu1 }
 0x3ca   : > { %2816 = vst [vmem:[%s3727_s9 + $0x68] sm:$0xff] %v2337_v44  ;;  %v2318_v47 = vadd.f32 %v2317_v58, %v2028_v45 }
 0x3cb   : > { %v2301_v18 = vpop.f32.mrf.mxu2 }
 0x3cc   : > { %v2302_v35 = vadd.f32 %v2301_v18, %v2288_v2 }
 0x3cd   : > { %v2331_v46 = vpop.f32.mrf.mxu0 }
 0x3ce   : > { %v2336_v3 = vmax.f32 %v2302_v35, 0.0  ;;  %v2332_v34 = vadd.f32 %v2331_v46, %v2318_v47 }
 0x3cf   : > { %v2289_v21 = vpop.f32.mrf.mxu3 }
 0x3d0   : > { %2815 = vst [vmem:[%s3727_s9 + $0x60] sm:$0xff] %v2336_v3  ;;  %v2341_v53 = vmax.f32 %v2332_v34, 0.0  ;;  %v2290_v42 = vadd.f32 %v2289_v21, %v2028_v45 }
 0x3d2   : > { %2818 = vst [vmem:[%s3727_s9 + $0x78] sm:$0xff] %v2341_v53 }
 0x3d3   : > { %v2303_v16 = vpop.f32.mrf.mxu2 }
 0x3d4   : > { %v2304_v62 = vadd.f32 %v2303_v16, %v2290_v42 }
 0x3d6   : > { %v2340_v8 = vmax.f32 %v2304_v62, 0.0 }
 0x3d8   : > { %2817 = vst [vmem:[%s3727_s9 + $0x70] sm:$0xff] %v2340_v8 }
 0x3d9   : > { %s2904_s8 = sshll.u32 %s3162_s19, 6  ;;  %s2376_s13 = sshll.u32 %s3727_s9, 4  ;;  %s2377_s13 = int_to_ptr.vmem [resolvable:$true] %s2376_s13 }
 0x3da   : > { %s2365_s29 = scalar_lea.hbm %s4300_s4, %s2904_s8  ;;  %s3109_s22 = smov 1024  }
 0x3db   : > { %s2378_s10 = sshll.u32 %s2365_s29, 4  ;;  %2911 = sst [smem:[#allocation11]] (%p3193_p11), %s3109_s22  ;;  %s2379_s10 = int_to_ptr.hbm [resolvable:$true] %s2378_s10 }
 0x3dc   : > { %s3110_s14 = smov 2048   ;;  %s3111_s30 = smov 4  }
 0x3dd   : > { %2912 = sst [smem:[#allocation11 + $0x1]] (%p3193_p11), %s3110_s14  ;;  %s3112_s19 = smov 256  }
 0x3de   : > { %2913 = sst [smem:[#allocation11 + $0x2]] (%p3193_p11), %s3111_s30  ;;  %s3113_s9 = smov 16  }
 0x3df   : > { %2914 = sst [smem:[#allocation11 + $0x3]] (%p3193_p11), %s3112_s19  ;;  %s3114_s5 = smov [#allocation10]  }
 0x3e0   : > { %2915 = sst [smem:[#allocation11 + $0x4]] (%p3193_p11), %s3112_s19  ;;  %s3115_s7 = smov 0  }
 0x3e1   : > { %2916 = sst [smem:[#allocation11 + $0x5]] (%p3193_p11), %s3113_s9 }
 0x3e2   : > { %2917 = dma.general (%p3193_p11), %s2377_s13, 2048, %s2379_s10, %s2353_s6, %s3114_s5, [#allocation11], %s3115_s7, 0  }
 0x3e3 PF: > { %s2406_s25 = sand.u32 1, %s3081_s15   ;;  %p4309_p4 = scmp.ge.s32.totalorder %s3093_s18, 2 }
 0x3e4   : > { %s2407_s11 = scalar_lea.sflag [#allocation6], %s2406_s25 }
 0x3e5   : > { %p2928_p6 = pnand %p4309_p4, %p3197_p12 }
 0x3e7   : > { %p2929_p13 = pneg %p2928_p6 }
 0x3e9   : > { %3076 = dma.done.wait (%p2929_p13), %s2407_s11, 2048  }
 0x3ea   : > { %3078 = vsyncadd (%p2929_p13), %s2407_s11, 4294965248  ;;  %p18_p0 = scmp.ge.s32.totalorder %s3166_s21, 4   ;;  %s4310_s15 = smov %s3085_s16 }
 0x3eb   : > { %s4311_s16 = smov %s3089_s17  ;;  %s4312_s17 = smov %s3178_s24 }
 0x3ec   : > { %s4313_s18 = smov %s3166_s21  ;;  %20 = sbr.rel (!%p18_p0) target bundleno = 8 (0x8), region = 97 }
 0x3f1   :  { %2413 = vsyncpa [#allocation5], 1 }
 0x3f2   :  { %2415 = vsyncpa [#allocation5 + $0x1], 1 }
 0x3f3   :  { %2416 = vsyncpa [#allocation8], 1 }
 0x3f4   :  { %2417 = vsyncpa [#allocation6], 1 }
 0x3f5   :  { %2419 = vsyncpa [#allocation6 + $0x1], 1 }

</bundles_post_ra>
